<compile_context>
chip_gen: v7x
topology: tpu7x:2x2x1
jax: 0.10.0
libtpu: 0.0.40
codegen_flags: <defaults>
</compile_context>

<pallas_src>
import functools
import math

import jax
import jax.numpy as jnp
import numpy as np
from jax.experimental import pallas as pl
from jax.experimental.pallas import tpu as pltpu


def _dit_attention_kernel(x_ref, t_ref, wmod_ref, bmod_ref, wqkv_ref,
                          n2_ref, n3_ref, cos_ref, sin_ref, wo_ref,
                          o_ref, *, heads, eps):
    bf16 = jnp.bfloat16
    T, H = x_ref.shape[1], x_ref.shape[2]
    e = H // heads
    r = e // 4                      # width of each (even / odd) group of the rotated half

    # ---- GatedModulation: single [1,Td] @ [Td,3H] matmul, slice shift/scale/gate ----
    t = t_ref[0].astype(jnp.float32)                                  # [1, Td]
    st = (t * jax.nn.sigmoid(t)).astype(bf16)                         # silu -> bf16 MXU input
    mod = jnp.dot(st, wmod_ref[...], preferred_element_type=jnp.float32) + bmod_ref[...]
    shift, scale, gate = mod[:, :H], mod[:, H:2 * H], mod[:, 2 * H:]  # [1, H] each

    # ---- norm_1 (LayerNorm over H, no affine) + modulate; cast to bf16 once ----
    xb = x_ref[0].astype(jnp.float32)                                 # [T, H]
    mu = jnp.mean(xb, axis=-1, keepdims=True)
    var = jnp.mean(jnp.square(xb - mu), axis=-1, keepdims=True)
    xn = (xb - mu) * jax.lax.rsqrt(var + eps)
    xm = (xn * (scale + 1.0) + shift).astype(bf16)                    # [T, H] bf16

    # ---- fused qkv projection: ONE [T,H] @ [H,3H] matmul (full MXU N fill) ----
    qkv = jnp.dot(xm, wqkv_ref[...], preferred_element_type=jnp.float32)   # [T, 3H] f32

    cos = cos_ref[...]                                                # [T, e//4]
    sin = sin_ref[...]
    n2 = n2_ref[...]                                                  # [1, e], has 1/sqrt(e) folded in
    n3 = n3_ref[...]                                                  # [1, e]

    def head_norm(z, w):                    # LayerNorm over e (weight, no bias), f32
        m = jnp.mean(z, axis=-1, keepdims=True)
        s2 = jnp.mean(jnp.square(z - m), axis=-1, keepdims=True)
        return (z - m) * jax.lax.rsqrt(s2 + eps) * w

    def rope(z):
        # Host de-interleaved per-head layout: [even (r) | odd (r) | pass (e/2)].
        ze, zo, zp = z[:, :r], z[:, r:2 * r], z[:, 2 * r:]
        return jnp.concatenate([ze * cos - zo * sin, zo * cos + ze * sin, zp], axis=-1)

    # ---- per-head attention, unrolled (heads is small; avoids per-head grid steps) ----
    outs = []
    for h in range(heads):
        q = rope(head_norm(qkv[:, h * e:(h + 1) * e], n2))            # already * 1/sqrt(e)
        k = rope(head_norm(qkv[:, H + h * e:H + (h + 1) * e], n3))
        v = qkv[:, 2 * H + h * e:2 * H + (h + 1) * e]
        s = jax.lax.dot_general(q.astype(bf16), k.astype(bf16),
                                (((1,), (1,)), ((), ())),
                                preferred_element_type=jnp.float32)   # [T, T]
        s = s - jnp.max(s, axis=-1, keepdims=True)
        p = jnp.exp(s)
        p = p * pl.reciprocal(jnp.sum(p, axis=-1, keepdims=True), approx=True)
        o = jnp.dot(p.astype(bf16), v.astype(bf16),
                    preferred_element_type=jnp.float32)               # [T, e]
        outs.append(o.astype(bf16))

    # ---- single output projection with K = H, then gate ----
    o_cat = jnp.concatenate(outs, axis=-1)                            # [T, H] bf16
    out = jnp.dot(o_cat, wo_ref[...], preferred_element_type=jnp.float32) * gate
    o_ref[0] = out.astype(o_ref.dtype)


def dit_attention(x, time, position, params, *, heads, eps):
    """x: [B, T, H], time: [B, Td] (broadcast over tokens, i.e. time.unsqueeze(1) in the
    PyTorch call), position: [T, e//4, 2] of (cos, sin) pairs."""
    B, T, H = x.shape
    Td = time.shape[-1]
    assert H % heads == 0
    e = H // heads
    assert e % 4 == 0, "RoPE rotates interleaved pairs of the first half of e"
    r = e // 4

    bf16, f32 = jnp.bfloat16, jnp.float32

    # RoPE de-interleave permutation (per head): [evens of rotated half | odds | pass].
    perm = np.concatenate([np.arange(0, e // 2, 2),
                           np.arange(1, e // 2, 2),
                           np.arange(e // 2, e)])

    # ---- host-side, one-time weight re-layout ----
    w_mod = params["w_mod"].astype(bf16)                              # [Td, 3H]
    b_mod = params["b_mod"].astype(f32).reshape(1, 3 * H)

    wqkv = params["w_qkv"].astype(f32).reshape(H, 3, heads, e)        # cols = (n, head, e)
    wq = wqkv[:, 0][:, :, perm]                                       # de-interleave q cols
    wk = wqkv[:, 1][:, :, perm]                                       # de-interleave k cols
    wv = wqkv[:, 2]                                                   # v keeps original layout
    wqkv_p = jnp.stack([wq, wk, wv], axis=1).reshape(H, 3 * H).astype(bf16)

    # Per-head norm weights, permuted like q/k; attention scale folded into the q norm.
    n2 = (params["w_norm2"].astype(f32)[perm] / math.sqrt(e)).reshape(1, e)
    n3 = params["w_norm3"].astype(f32)[perm].reshape(1, e)

    cos = position[:T, :, 0].astype(f32)                              # [T, e//4]
    sin = position[:T, :, 1].astype(f32)

    w_out = params["w_out"].astype(bf16)                              # [H, H]

    time3 = time.reshape(B, 1, Td)        # keep block last-two-dims == full array dims

    kernel = functools.partial(_dit_attention_kernel, heads=heads, eps=float(eps))
    const2 = lambda b: (0, 0)

    return pl.pallas_call(
        kernel,
        out_shape=jax.ShapeDtypeStruct((B, T, H), x.dtype),
        grid=(B,),
        in_specs=[
            pl.BlockSpec((1, T, H), lambda b: (b, 0, 0)),      # x
            pl.BlockSpec((1, 1, Td), lambda b: (b, 0, 0)),     # time
            pl.BlockSpec((Td, 3 * H), const2),                 # W_mod (shift|scale|gate)
            pl.BlockSpec((1, 3 * H), const2),                  # b_mod
            pl.BlockSpec((H, 3 * H), const2),                  # W_qkv (q/k cols de-interleaved)
            pl.BlockSpec((1, e), const2),                      # norm_2 weight * 1/sqrt(e)
            pl.BlockSpec((1, e), const2),                      # norm_3 weight
            pl.BlockSpec((T, r), const2),                      # rope cos
            pl.BlockSpec((T, r), const2),                      # rope sin
            pl.BlockSpec((H, H), const2),                      # W_out
        ],
        out_specs=pl.BlockSpec((1, T, H), lambda b: (b, 0, 0)),
        compiler_params=pltpu.CompilerParams(
            dimension_semantics=("parallel",),
            vmem_limit_bytes=32 * 1024 * 1024),
    )(x, time3, w_mod, b_mod, wqkv_p, n2, n3, cos, sin, w_out)


def _reference(x, time, position, params, *, heads, eps):
    """Pure-JAX (f32) equivalent of the PyTorch Attention.forward."""
    B, T, H = x.shape
    e = H // heads
    x = x.astype(jnp.float32)
    time = time.astype(jnp.float32)

    mu = jnp.mean(x, -1, keepdims=True)
    var = jnp.mean(jnp.square(x - mu), -1, keepdims=True)
    xn = (x - mu) / jnp.sqrt(var + eps)

    st = time * jax.nn.sigmoid(time)
    y = st @ params["w_mod"] + params["b_mod"]
    shift, scale, gate = jnp.split(y, 3, axis=-1)
    xm = xn * (scale[:, None, :] + 1.0) + shift[:, None, :]

    qkv = xm @ params["w_qkv"]                                            # [B, T, 3H]
    qkv = jnp.transpose(qkv.reshape(B, T, 3, heads, e), (2, 0, 3, 1, 4))  # n b h t e
    q, k, v = qkv[0], qkv[1], qkv[2]

    def ln(z, w):
        m = jnp.mean(z, -1, keepdims=True)
        s2 = jnp.mean(jnp.square(z - m), -1, keepdims=True)
        return (z - m) / jnp.sqrt(s2 + eps) * w

    q = ln(q, params["w_norm2"])
    k = ln(k, params["w_norm3"])

    def rope(z):
        zr, zp = jnp.split(z, 2, axis=-1)
        zr = zr.reshape(*zr.shape[:-1], -1, 2)                    # [..., e//4, 2]
        p = position[:T].reshape(1, 1, T, zr.shape[-2], 2)
        out = jnp.stack([zr[..., 0] * p[..., 0] - zr[..., 1] * p[..., 1],
                         zr[..., 1] * p[..., 0] + zr[..., 0] * p[..., 1]], axis=-1)
        return jnp.concatenate([out.reshape(*z.shape[:-1], -1), zp], axis=-1)

    q, k = rope(q), rope(k)

    s = jnp.einsum('bhte,bhse->bhts', q, k) / math.sqrt(e)
    p = jax.nn.softmax(s, axis=-1)
    o = jnp.einsum('bhts,bhse->bhte', p, v)
    o = jnp.transpose(o, (0, 2, 1, 3)).reshape(B, T, H)
    return (o @ params["w_out"]) * gate[:, None, :]


if __name__ == "__main__":
    B, T, H, heads, Td = 2, 16, 32, 4, 32
    e = H // heads            # 8
    eps = 1e-6

    key = jax.random.PRNGKey(0)
    ks = jax.random.split(key, 8)

    x = jax.random.normal(ks[0], (B, T, H), jnp.float32)
    time = jax.random.normal(ks[1], (B, Td), jnp.float32)

    # RoPE position table: [T, e//4, 2] of (cos, sin) pairs.
    angles = (jnp.arange(T, dtype=jnp.float32)[:, None] /
              (50.0 ** (jnp.arange(e // 4, dtype=jnp.float32)[None, :] / max(e // 4, 1))))
    position = jnp.stack([jnp.cos(angles), jnp.sin(angles)], axis=-1)

    # Matmul weights are rounded through bf16 once so the bf16-MXU kernel and the f32
    # reference share identical parameter values (only activation rounding differs).
    def q8(w):
        return w.astype(jnp.bfloat16).astype(jnp.float32)

    params = {
        # Deviation from the module's zero-init (would be a trivial no-op otherwise).
        "w_mod": q8(0.02 * jax.random.normal(ks[2], (Td, 3 * H), jnp.float32)),
        "b_mod": 0.01 * jax.random.normal(ks[3], (3 * H,), jnp.float32),
        "w_qkv": q8(jax.random.normal(ks[4], (H, 3 * H), jnp.float32) / math.sqrt(H)),
        "w_out": q8(jax.random.normal(ks[5], (H, H), jnp.float32) / math.sqrt(H)),
        # Deviation from the ones-init of the per-head norm weights (to exercise them).
        "w_norm2": 1.0 + 0.1 * jax.random.normal(ks[6], (e,), jnp.float32),
        "w_norm3": 1.0 + 0.1 * jax.random.normal(ks[7], (e,), jnp.float32),
    }

    out = dit_attention(x, time, position, params, heads=heads, eps=eps)
    jax.block_until_ready(out)

    ref = _reference(x, time, position, params, heads=heads, eps=eps)
    assert out.shape == ref.shape
    err = float(jnp.max(jnp.abs(out - ref)))
    # Tolerance loosened for bf16 MXU inputs (f32 accumulation) + approx reciprocal.
    assert jnp.allclose(out, ref, atol=2e-2, rtol=2e-2), err

    print("KERNEL_OK")
</pallas_src>

<mosaic_0001>
module attributes {stable_mosaic.version = 11 : i64} {
  func.func @_dit_attention_kernel(%arg0: i32, %arg1: memref<1x16x32xf32, #tpu.memory_space<vmem>>, %arg2: memref<1x1x32xf32, #tpu.memory_space<vmem>>, %arg3: memref<32x96xbf16, #tpu.memory_space<vmem>>, %arg4: memref<1x96xf32, #tpu.memory_space<vmem>>, %arg5: memref<32x96xbf16, #tpu.memory_space<vmem>>, %arg6: memref<1x8xf32, #tpu.memory_space<vmem>>, %arg7: memref<1x8xf32, #tpu.memory_space<vmem>>, %arg8: memref<16x2xf32, #tpu.memory_space<vmem>>, %arg9: memref<16x2xf32, #tpu.memory_space<vmem>>, %arg10: memref<32x32xbf16, #tpu.memory_space<vmem>>, %arg11: memref<1x16x32xf32, #tpu.memory_space<vmem>>) attributes {dimension_semantics = [#tpu.dimension_semantics<parallel>], iteration_bounds = array<i64: 2>, scalar_prefetch = 0 : i64, scratch_operands = 0 : i64, tpu.core_type = #tpu.core_type<tc>, window_params = [{transform_indices = @transform_0, window_bounds = array<i64: 1, 16, 32>}, {transform_indices = @transform_1, window_bounds = array<i64: 1, 1, 32>}, {pipeline_mode = #tpu.pipeline_mode<synchronous>, transform_indices = @transform_2, window_bounds = array<i64: 32, 96>}, {pipeline_mode = #tpu.pipeline_mode<synchronous>, transform_indices = @transform_3, window_bounds = array<i64: 1, 96>}, {pipeline_mode = #tpu.pipeline_mode<synchronous>, transform_indices = @transform_4, window_bounds = array<i64: 32, 96>}, {pipeline_mode = #tpu.pipeline_mode<synchronous>, transform_indices = @transform_5, window_bounds = array<i64: 1, 8>}, {pipeline_mode = #tpu.pipeline_mode<synchronous>, transform_indices = @transform_6, window_bounds = array<i64: 1, 8>}, {pipeline_mode = #tpu.pipeline_mode<synchronous>, transform_indices = @transform_7, window_bounds = array<i64: 16, 2>}, {pipeline_mode = #tpu.pipeline_mode<synchronous>, transform_indices = @transform_8, window_bounds = array<i64: 16, 2>}, {pipeline_mode = #tpu.pipeline_mode<synchronous>, transform_indices = @transform_9, window_bounds = array<i64: 32, 32>}, {transform_indices = @transform_10, window_bounds = array<i64: 1, 16, 32>}]} {
    %c0 = arith.constant 0 : index
    %c0_0 = arith.constant 0 : index
    %c0_1 = arith.constant 0 : index
    %0 = vector.load %arg2[%c0, %c0_0, %c0_1] : memref<1x1x32xf32, #tpu.memory_space<vmem>>, vector<1x1x32xf32>
    %1 = vector.shape_cast %0 : vector<1x1x32xf32> to vector<1x32xf32>
    %2 = arith.negf %1 : vector<1x32xf32>
    %3 = math.exp %2 : vector<1x32xf32>
    %cst = arith.constant 1.000000e+00 : f32
    %4 = vector.broadcast %cst : f32 to vector<1x32xf32>
    %5 = arith.addf %4, %3 : vector<1x32xf32>
    %6 = arith.divf %4, %5 : vector<1x32xf32>
    %7 = arith.mulf %1, %6 : vector<1x32xf32>
    %8 = arith.truncf %7 : vector<1x32xf32> to vector<1x32xbf16>
    %c0_2 = arith.constant 0 : index
    %c0_3 = arith.constant 0 : index
    %9 = vector.load %arg3[%c0_2, %c0_3] : memref<32x96xbf16, #tpu.memory_space<vmem>>, vector<32x96xbf16>
    %cst_4 = arith.constant dense<0.000000e+00> : vector<1x96xf32>
    %10 = tpu.matmul %8, %9, %cst_4 {dimension_numbers = #tpu.dot_dimension_numbers<[1], [0], [0], [1], [0, 0, 1, 1], [], []>} : vector<1x32xbf16>, vector<32x96xbf16>, vector<1x96xf32> -> vector<1x96xf32>
    %c0_5 = arith.constant 0 : index
    %c0_6 = arith.constant 0 : index
    %11 = vector.load %arg4[%c0_5, %c0_6] : memref<1x96xf32, #tpu.memory_space<vmem>>, vector<1x96xf32>
    %12 = arith.addf %10, %11 : vector<1x96xf32>
    %13 = vector.extract_strided_slice %12 {offsets = [0, 0], sizes = [1, 32], strides = [1, 1]} : vector<1x96xf32> to vector<1x32xf32>
    %14 = vector.extract_strided_slice %12 {offsets = [0, 32], sizes = [1, 32], strides = [1, 1]} : vector<1x96xf32> to vector<1x32xf32>
    %15 = vector.extract_strided_slice %12 {offsets = [0, 64], sizes = [1, 32], strides = [1, 1]} : vector<1x96xf32> to vector<1x32xf32>
    %c0_7 = arith.constant 0 : index
    %c0_8 = arith.constant 0 : index
    %c0_9 = arith.constant 0 : index
    %16 = vector.load %arg1[%c0_7, %c0_8, %c0_9] : memref<1x16x32xf32, #tpu.memory_space<vmem>>, vector<1x16x32xf32>
    %17 = vector.shape_cast %16 : vector<1x16x32xf32> to vector<16x32xf32>
    %cst_10 = arith.constant dense<0.000000e+00> : vector<16xf32>
    %18 = vector.multi_reduction <add>, %17, %cst_10 [1] : vector<16x32xf32> to vector<16xf32>
    %19 = vector.shape_cast %18 : vector<16xf32> to vector<16x1xf32>
    %cst_11 = arith.constant 3.200000e+01 : f32
    %20 = vector.broadcast %cst_11 : f32 to vector<16x1xf32>
    %21 = arith.divf %19, %20 : vector<16x1xf32>
    %22 = vector.broadcast %21 : vector<16x1xf32> to vector<16x32xf32>
    %23 = arith.subf %17, %22 : vector<16x32xf32>
    %24 = arith.mulf %23, %23 : vector<16x32xf32>
    %cst_12 = arith.constant dense<0.000000e+00> : vector<16xf32>
    %25 = vector.multi_reduction <add>, %24, %cst_12 [1] : vector<16x32xf32> to vector<16xf32>
    %26 = vector.shape_cast %25 : vector<16xf32> to vector<16x1xf32>
    %cst_13 = arith.constant 3.200000e+01 : f32
    %27 = vector.broadcast %cst_13 : f32 to vector<16x1xf32>
    %28 = arith.divf %26, %27 : vector<16x1xf32>
    %29 = vector.broadcast %21 : vector<16x1xf32> to vector<16x32xf32>
    %30 = arith.subf %17, %29 : vector<16x32xf32>
    %cst_14 = arith.constant 9.99999997E-7 : f32
    %31 = vector.broadcast %cst_14 : f32 to vector<16x1xf32>
    %32 = arith.addf %28, %31 : vector<16x1xf32>
    %33 = math.rsqrt %32 : vector<16x1xf32>
    %34 = vector.broadcast %33 : vector<16x1xf32> to vector<16x32xf32>
    %35 = arith.mulf %30, %34 : vector<16x32xf32>
    %cst_15 = arith.constant 1.000000e+00 : f32
    %36 = vector.broadcast %cst_15 : f32 to vector<1x32xf32>
    %37 = arith.addf %14, %36 : vector<1x32xf32>
    %38 = vector.broadcast %37 : vector<1x32xf32> to vector<16x32xf32>
    %39 = arith.mulf %35, %38 : vector<16x32xf32>
    %40 = vector.broadcast %13 : vector<1x32xf32> to vector<16x32xf32>
    %41 = arith.addf %39, %40 : vector<16x32xf32>
    %42 = arith.truncf %41 : vector<16x32xf32> to vector<16x32xbf16>
    %c0_16 = arith.constant 0 : index
    %c0_17 = arith.constant 0 : index
    %43 = vector.load %arg5[%c0_16, %c0_17] : memref<32x96xbf16, #tpu.memory_space<vmem>>, vector<32x96xbf16>
    %cst_18 = arith.constant dense<0.000000e+00> : vector<16x96xf32>
    %44 = tpu.matmul %42, %43, %cst_18 {dimension_numbers = #tpu.dot_dimension_numbers<[1], [0], [0], [1], [0, 0, 1, 1], [], []>} : vector<16x32xbf16>, vector<32x96xbf16>, vector<16x96xf32> -> vector<16x96xf32>
    %c0_19 = arith.constant 0 : index
    %c0_20 = arith.constant 0 : index
    %45 = vector.load %arg8[%c0_19, %c0_20] : memref<16x2xf32, #tpu.memory_space<vmem>>, vector<16x2xf32>
    %c0_21 = arith.constant 0 : index
    %c0_22 = arith.constant 0 : index
    %46 = vector.load %arg9[%c0_21, %c0_22] : memref<16x2xf32, #tpu.memory_space<vmem>>, vector<16x2xf32>
    %c0_23 = arith.constant 0 : index
    %c0_24 = arith.constant 0 : index
    %47 = vector.load %arg6[%c0_23, %c0_24] : memref<1x8xf32, #tpu.memory_space<vmem>>, vector<1x8xf32>
    %c0_25 = arith.constant 0 : index
    %c0_26 = arith.constant 0 : index
    %48 = vector.load %arg7[%c0_25, %c0_26] : memref<1x8xf32, #tpu.memory_space<vmem>>, vector<1x8xf32>
    %49 = vector.extract_strided_slice %44 {offsets = [0, 0], sizes = [16, 8], strides = [1, 1]} : vector<16x96xf32> to vector<16x8xf32>
    %cst_27 = arith.constant dense<0.000000e+00> : vector<16xf32>
    %50 = vector.multi_reduction <add>, %49, %cst_27 [1] : vector<16x8xf32> to vector<16xf32>
    %51 = vector.shape_cast %50 : vector<16xf32> to vector<16x1xf32>
    %cst_28 = arith.constant 8.000000e+00 : f32
    %52 = vector.broadcast %cst_28 : f32 to vector<16x1xf32>
    %53 = arith.divf %51, %52 : vector<16x1xf32>
    %54 = vector.broadcast %53 : vector<16x1xf32> to vector<16x8xf32>
    %55 = arith.subf %49, %54 : vector<16x8xf32>
    %56 = arith.mulf %55, %55 : vector<16x8xf32>
    %cst_29 = arith.constant dense<0.000000e+00> : vector<16xf32>
    %57 = vector.multi_reduction <add>, %56, %cst_29 [1] : vector<16x8xf32> to vector<16xf32>
    %58 = vector.shape_cast %57 : vector<16xf32> to vector<16x1xf32>
    %cst_30 = arith.constant 8.000000e+00 : f32
    %59 = vector.broadcast %cst_30 : f32 to vector<16x1xf32>
    %60 = arith.divf %58, %59 : vector<16x1xf32>
    %61 = vector.broadcast %53 : vector<16x1xf32> to vector<16x8xf32>
    %62 = arith.subf %49, %61 : vector<16x8xf32>
    %cst_31 = arith.constant 9.99999997E-7 : f32
    %63 = vector.broadcast %cst_31 : f32 to vector<16x1xf32>
    %64 = arith.addf %60, %63 : vector<16x1xf32>
    %65 = math.rsqrt %64 : vector<16x1xf32>
    %66 = vector.broadcast %65 : vector<16x1xf32> to vector<16x8xf32>
    %67 = arith.mulf %62, %66 : vector<16x8xf32>
    %68 = vector.broadcast %47 : vector<1x8xf32> to vector<16x8xf32>
    %69 = arith.mulf %67, %68 : vector<16x8xf32>
    %70 = vector.extract_strided_slice %69 {offsets = [0, 0], sizes = [16, 2], strides = [1, 1]} : vector<16x8xf32> to vector<16x2xf32>
    %71 = vector.extract_strided_slice %69 {offsets = [0, 2], sizes = [16, 2], strides = [1, 1]} : vector<16x8xf32> to vector<16x2xf32>
    %72 = vector.extract_strided_slice %69 {offsets = [0, 4], sizes = [16, 4], strides = [1, 1]} : vector<16x8xf32> to vector<16x4xf32>
    %73 = arith.mulf %70, %45 : vector<16x2xf32>
    %74 = arith.mulf %71, %46 : vector<16x2xf32>
    %75 = arith.subf %73, %74 : vector<16x2xf32>
    %76 = arith.mulf %71, %45 : vector<16x2xf32>
    %77 = arith.mulf %70, %46 : vector<16x2xf32>
    %78 = arith.addf %76, %77 : vector<16x2xf32>
    %79 = tpu.concatenate %75, %78, %72 in 1 : vector<16x2xf32>, vector<16x2xf32>, vector<16x4xf32> -> vector<16x8xf32>
    %80 = vector.extract_strided_slice %44 {offsets = [0, 32], sizes = [16, 8], strides = [1, 1]} : vector<16x96xf32> to vector<16x8xf32>
    %cst_32 = arith.constant dense<0.000000e+00> : vector<16xf32>
    %81 = vector.multi_reduction <add>, %80, %cst_32 [1] : vector<16x8xf32> to vector<16xf32>
    %82 = vector.shape_cast %81 : vector<16xf32> to vector<16x1xf32>
    %cst_33 = arith.constant 8.000000e+00 : f32
    %83 = vector.broadcast %cst_33 : f32 to vector<16x1xf32>
    %84 = arith.divf %82, %83 : vector<16x1xf32>
    %85 = vector.broadcast %84 : vector<16x1xf32> to vector<16x8xf32>
    %86 = arith.subf %80, %85 : vector<16x8xf32>
    %87 = arith.mulf %86, %86 : vector<16x8xf32>
    %cst_34 = arith.constant dense<0.000000e+00> : vector<16xf32>
    %88 = vector.multi_reduction <add>, %87, %cst_34 [1] : vector<16x8xf32> to vector<16xf32>
    %89 = vector.shape_cast %88 : vector<16xf32> to vector<16x1xf32>
    %cst_35 = arith.constant 8.000000e+00 : f32
    %90 = vector.broadcast %cst_35 : f32 to vector<16x1xf32>
    %91 = arith.divf %89, %90 : vector<16x1xf32>
    %92 = vector.broadcast %84 : vector<16x1xf32> to vector<16x8xf32>
    %93 = arith.subf %80, %92 : vector<16x8xf32>
    %cst_36 = arith.constant 9.99999997E-7 : f32
    %94 = vector.broadcast %cst_36 : f32 to vector<16x1xf32>
    %95 = arith.addf %91, %94 : vector<16x1xf32>
    %96 = math.rsqrt %95 : vector<16x1xf32>
    %97 = vector.broadcast %96 : vector<16x1xf32> to vector<16x8xf32>
    %98 = arith.mulf %93, %97 : vector<16x8xf32>
    %99 = vector.broadcast %48 : vector<1x8xf32> to vector<16x8xf32>
    %100 = arith.mulf %98, %99 : vector<16x8xf32>
    %101 = vector.extract_strided_slice %100 {offsets = [0, 0], sizes = [16, 2], strides = [1, 1]} : vector<16x8xf32> to vector<16x2xf32>
    %102 = vector.extract_strided_slice %100 {offsets = [0, 2], sizes = [16, 2], strides = [1, 1]} : vector<16x8xf32> to vector<16x2xf32>
    %103 = vector.extract_strided_slice %100 {offsets = [0, 4], sizes = [16, 4], strides = [1, 1]} : vector<16x8xf32> to vector<16x4xf32>
    %104 = arith.mulf %101, %45 : vector<16x2xf32>
    %105 = arith.mulf %102, %46 : vector<16x2xf32>
    %106 = arith.subf %104, %105 : vector<16x2xf32>
    %107 = arith.mulf %102, %45 : vector<16x2xf32>
    %108 = arith.mulf %101, %46 : vector<16x2xf32>
    %109 = arith.addf %107, %108 : vector<16x2xf32>
    %110 = tpu.concatenate %106, %109, %103 in 1 : vector<16x2xf32>, vector<16x2xf32>, vector<16x4xf32> -> vector<16x8xf32>
    %111 = vector.extract_strided_slice %44 {offsets = [0, 64], sizes = [16, 8], strides = [1, 1]} : vector<16x96xf32> to vector<16x8xf32>
    %112 = arith.truncf %79 : vector<16x8xf32> to vector<16x8xbf16>
    %113 = arith.truncf %110 : vector<16x8xf32> to vector<16x8xbf16>
    %cst_37 = arith.constant dense<0.000000e+00> : vector<16x16xf32>
    %114 = tpu.matmul %112, %113, %cst_37 {dimension_numbers = #tpu.dot_dimension_numbers<[1], [1], [0], [0], [0, 0, 1, 0], [], []>} : vector<16x8xbf16>, vector<16x8xbf16>, vector<16x16xf32> -> vector<16x16xf32>
    %cst_38 = arith.constant dense<0xFF800000> : vector<16xf32>
    %115 = vector.multi_reduction <maximumf>, %114, %cst_38 [1] : vector<16x16xf32> to vector<16xf32>
    %116 = vector.shape_cast %115 : vector<16xf32> to vector<16x1xf32>
    %117 = vector.broadcast %116 : vector<16x1xf32> to vector<16x16xf32>
    %118 = arith.subf %114, %117 : vector<16x16xf32>
    %119 = math.exp %118 : vector<16x16xf32>
    %cst_39 = arith.constant dense<0.000000e+00> : vector<16xf32>
    %120 = vector.multi_reduction <add>, %119, %cst_39 [1] : vector<16x16xf32> to vector<16xf32>
    %121 = vector.shape_cast %120 : vector<16xf32> to vector<16x1xf32>
    %122 = tpu.reciprocal %121 {approx = true} : vector<16x1xf32> -> vector<16x1xf32>
    %123 = vector.broadcast %122 : vector<16x1xf32> to vector<16x16xf32>
    %124 = arith.mulf %119, %123 : vector<16x16xf32>
    %125 = arith.truncf %124 : vector<16x16xf32> to vector<16x16xbf16>
    %126 = arith.truncf %111 : vector<16x8xf32> to vector<16x8xbf16>
    %cst_40 = arith.constant dense<0.000000e+00> : vector<16x8xf32>
    %127 = tpu.matmul %125, %126, %cst_40 {dimension_numbers = #tpu.dot_dimension_numbers<[1], [0], [0], [1], [0, 0, 1, 1], [], []>} : vector<16x16xbf16>, vector<16x8xbf16>, vector<16x8xf32> -> vector<16x8xf32>
    %128 = arith.truncf %127 : vector<16x8xf32> to vector<16x8xbf16>
    %129 = vector.extract_strided_slice %44 {offsets = [0, 8], sizes = [16, 8], strides = [1, 1]} : vector<16x96xf32> to vector<16x8xf32>
    %cst_41 = arith.constant dense<0.000000e+00> : vector<16xf32>
    %130 = vector.multi_reduction <add>, %129, %cst_41 [1] : vector<16x8xf32> to vector<16xf32>
    %131 = vector.shape_cast %130 : vector<16xf32> to vector<16x1xf32>
    %cst_42 = arith.constant 8.000000e+00 : f32
    %132 = vector.broadcast %cst_42 : f32 to vector<16x1xf32>
    %133 = arith.divf %131, %132 : vector<16x1xf32>
    %134 = vector.broadcast %133 : vector<16x1xf32> to vector<16x8xf32>
    %135 = arith.subf %129, %134 : vector<16x8xf32>
    %136 = arith.mulf %135, %135 : vector<16x8xf32>
    %cst_43 = arith.constant dense<0.000000e+00> : vector<16xf32>
    %137 = vector.multi_reduction <add>, %136, %cst_43 [1] : vector<16x8xf32> to vector<16xf32>
    %138 = vector.shape_cast %137 : vector<16xf32> to vector<16x1xf32>
    %cst_44 = arith.constant 8.000000e+00 : f32
    %139 = vector.broadcast %cst_44 : f32 to vector<16x1xf32>
    %140 = arith.divf %138, %139 : vector<16x1xf32>
    %141 = vector.broadcast %133 : vector<16x1xf32> to vector<16x8xf32>
    %142 = arith.subf %129, %141 : vector<16x8xf32>
    %cst_45 = arith.constant 9.99999997E-7 : f32
    %143 = vector.broadcast %cst_45 : f32 to vector<16x1xf32>
    %144 = arith.addf %140, %143 : vector<16x1xf32>
    %145 = math.rsqrt %144 : vector<16x1xf32>
    %146 = vector.broadcast %145 : vector<16x1xf32> to vector<16x8xf32>
    %147 = arith.mulf %142, %146 : vector<16x8xf32>
    %148 = vector.broadcast %47 : vector<1x8xf32> to vector<16x8xf32>
    %149 = arith.mulf %147, %148 : vector<16x8xf32>
    %150 = vector.extract_strided_slice %149 {offsets = [0, 0], sizes = [16, 2], strides = [1, 1]} : vector<16x8xf32> to vector<16x2xf32>
    %151 = vector.extract_strided_slice %149 {offsets = [0, 2], sizes = [16, 2], strides = [1, 1]} : vector<16x8xf32> to vector<16x2xf32>
    %152 = vector.extract_strided_slice %149 {offsets = [0, 4], sizes = [16, 4], strides = [1, 1]} : vector<16x8xf32> to vector<16x4xf32>
    %153 = arith.mulf %150, %45 : vector<16x2xf32>
    %154 = arith.mulf %151, %46 : vector<16x2xf32>
    %155 = arith.subf %153, %154 : vector<16x2xf32>
    %156 = arith.mulf %151, %45 : vector<16x2xf32>
    %157 = arith.mulf %150, %46 : vector<16x2xf32>
    %158 = arith.addf %156, %157 : vector<16x2xf32>
    %159 = tpu.concatenate %155, %158, %152 in 1 : vector<16x2xf32>, vector<16x2xf32>, vector<16x4xf32> -> vector<16x8xf32>
    %160 = vector.extract_strided_slice %44 {offsets = [0, 40], sizes = [16, 8], strides = [1, 1]} : vector<16x96xf32> to vector<16x8xf32>
    %cst_46 = arith.constant dense<0.000000e+00> : vector<16xf32>
    %161 = vector.multi_reduction <add>, %160, %cst_46 [1] : vector<16x8xf32> to vector<16xf32>
    %162 = vector.shape_cast %161 : vector<16xf32> to vector<16x1xf32>
    %cst_47 = arith.constant 8.000000e+00 : f32
    %163 = vector.broadcast %cst_47 : f32 to vector<16x1xf32>
    %164 = arith.divf %162, %163 : vector<16x1xf32>
    %165 = vector.broadcast %164 : vector<16x1xf32> to vector<16x8xf32>
    %166 = arith.subf %160, %165 : vector<16x8xf32>
    %167 = arith.mulf %166, %166 : vector<16x8xf32>
    %cst_48 = arith.constant dense<0.000000e+00> : vector<16xf32>
    %168 = vector.multi_reduction <add>, %167, %cst_48 [1] : vector<16x8xf32> to vector<16xf32>
    %169 = vector.shape_cast %168 : vector<16xf32> to vector<16x1xf32>
    %cst_49 = arith.constant 8.000000e+00 : f32
    %170 = vector.broadcast %cst_49 : f32 to vector<16x1xf32>
    %171 = arith.divf %169, %170 : vector<16x1xf32>
    %172 = vector.broadcast %164 : vector<16x1xf32> to vector<16x8xf32>
    %173 = arith.subf %160, %172 : vector<16x8xf32>
    %cst_50 = arith.constant 9.99999997E-7 : f32
    %174 = vector.broadcast %cst_50 : f32 to vector<16x1xf32>
    %175 = arith.addf %171, %174 : vector<16x1xf32>
    %176 = math.rsqrt %175 : vector<16x1xf32>
    %177 = vector.broadcast %176 : vector<16x1xf32> to vector<16x8xf32>
    %178 = arith.mulf %173, %177 : vector<16x8xf32>
    %179 = vector.broadcast %48 : vector<1x8xf32> to vector<16x8xf32>
    %180 = arith.mulf %178, %179 : vector<16x8xf32>
    %181 = vector.extract_strided_slice %180 {offsets = [0, 0], sizes = [16, 2], strides = [1, 1]} : vector<16x8xf32> to vector<16x2xf32>
    %182 = vector.extract_strided_slice %180 {offsets = [0, 2], sizes = [16, 2], strides = [1, 1]} : vector<16x8xf32> to vector<16x2xf32>
    %183 = vector.extract_strided_slice %180 {offsets = [0, 4], sizes = [16, 4], strides = [1, 1]} : vector<16x8xf32> to vector<16x4xf32>
    %184 = arith.mulf %181, %45 : vector<16x2xf32>
    %185 = arith.mulf %182, %46 : vector<16x2xf32>
    %186 = arith.subf %184, %185 : vector<16x2xf32>
    %187 = arith.mulf %182, %45 : vector<16x2xf32>
    %188 = arith.mulf %181, %46 : vector<16x2xf32>
    %189 = arith.addf %187, %188 : vector<16x2xf32>
    %190 = tpu.concatenate %186, %189, %183 in 1 : vector<16x2xf32>, vector<16x2xf32>, vector<16x4xf32> -> vector<16x8xf32>
    %191 = vector.extract_strided_slice %44 {offsets = [0, 72], sizes = [16, 8], strides = [1, 1]} : vector<16x96xf32> to vector<16x8xf32>
    %192 = arith.truncf %159 : vector<16x8xf32> to vector<16x8xbf16>
    %193 = arith.truncf %190 : vector<16x8xf32> to vector<16x8xbf16>
    %cst_51 = arith.constant dense<0.000000e+00> : vector<16x16xf32>
    %194 = tpu.matmul %192, %193, %cst_51 {dimension_numbers = #tpu.dot_dimension_numbers<[1], [1], [0], [0], [0, 0, 1, 0], [], []>} : vector<16x8xbf16>, vector<16x8xbf16>, vector<16x16xf32> -> vector<16x16xf32>
    %cst_52 = arith.constant dense<0xFF800000> : vector<16xf32>
    %195 = vector.multi_reduction <maximumf>, %194, %cst_52 [1] : vector<16x16xf32> to vector<16xf32>
    %196 = vector.shape_cast %195 : vector<16xf32> to vector<16x1xf32>
    %197 = vector.broadcast %196 : vector<16x1xf32> to vector<16x16xf32>
    %198 = arith.subf %194, %197 : vector<16x16xf32>
    %199 = math.exp %198 : vector<16x16xf32>
    %cst_53 = arith.constant dense<0.000000e+00> : vector<16xf32>
    %200 = vector.multi_reduction <add>, %199, %cst_53 [1] : vector<16x16xf32> to vector<16xf32>
    %201 = vector.shape_cast %200 : vector<16xf32> to vector<16x1xf32>
    %202 = tpu.reciprocal %201 {approx = true} : vector<16x1xf32> -> vector<16x1xf32>
    %203 = vector.broadcast %202 : vector<16x1xf32> to vector<16x16xf32>
    %204 = arith.mulf %199, %203 : vector<16x16xf32>
    %205 = arith.truncf %204 : vector<16x16xf32> to vector<16x16xbf16>
    %206 = arith.truncf %191 : vector<16x8xf32> to vector<16x8xbf16>
    %cst_54 = arith.constant dense<0.000000e+00> : vector<16x8xf32>
    %207 = tpu.matmul %205, %206, %cst_54 {dimension_numbers = #tpu.dot_dimension_numbers<[1], [0], [0], [1], [0, 0, 1, 1], [], []>} : vector<16x16xbf16>, vector<16x8xbf16>, vector<16x8xf32> -> vector<16x8xf32>
    %208 = arith.truncf %207 : vector<16x8xf32> to vector<16x8xbf16>
    %209 = vector.extract_strided_slice %44 {offsets = [0, 16], sizes = [16, 8], strides = [1, 1]} : vector<16x96xf32> to vector<16x8xf32>
    %cst_55 = arith.constant dense<0.000000e+00> : vector<16xf32>
    %210 = vector.multi_reduction <add>, %209, %cst_55 [1] : vector<16x8xf32> to vector<16xf32>
    %211 = vector.shape_cast %210 : vector<16xf32> to vector<16x1xf32>
    %cst_56 = arith.constant 8.000000e+00 : f32
    %212 = vector.broadcast %cst_56 : f32 to vector<16x1xf32>
    %213 = arith.divf %211, %212 : vector<16x1xf32>
    %214 = vector.broadcast %213 : vector<16x1xf32> to vector<16x8xf32>
    %215 = arith.subf %209, %214 : vector<16x8xf32>
    %216 = arith.mulf %215, %215 : vector<16x8xf32>
    %cst_57 = arith.constant dense<0.000000e+00> : vector<16xf32>
    %217 = vector.multi_reduction <add>, %216, %cst_57 [1] : vector<16x8xf32> to vector<16xf32>
    %218 = vector.shape_cast %217 : vector<16xf32> to vector<16x1xf32>
    %cst_58 = arith.constant 8.000000e+00 : f32
    %219 = vector.broadcast %cst_58 : f32 to vector<16x1xf32>
    %220 = arith.divf %218, %219 : vector<16x1xf32>
    %221 = vector.broadcast %213 : vector<16x1xf32> to vector<16x8xf32>
    %222 = arith.subf %209, %221 : vector<16x8xf32>
    %cst_59 = arith.constant 9.99999997E-7 : f32
    %223 = vector.broadcast %cst_59 : f32 to vector<16x1xf32>
    %224 = arith.addf %220, %223 : vector<16x1xf32>
    %225 = math.rsqrt %224 : vector<16x1xf32>
    %226 = vector.broadcast %225 : vector<16x1xf32> to vector<16x8xf32>
    %227 = arith.mulf %222, %226 : vector<16x8xf32>
    %228 = vector.broadcast %47 : vector<1x8xf32> to vector<16x8xf32>
    %229 = arith.mulf %227, %228 : vector<16x8xf32>
    %230 = vector.extract_strided_slice %229 {offsets = [0, 0], sizes = [16, 2], strides = [1, 1]} : vector<16x8xf32> to vector<16x2xf32>
    %231 = vector.extract_strided_slice %229 {offsets = [0, 2], sizes = [16, 2], strides = [1, 1]} : vector<16x8xf32> to vector<16x2xf32>
    %232 = vector.extract_strided_slice %229 {offsets = [0, 4], sizes = [16, 4], strides = [1, 1]} : vector<16x8xf32> to vector<16x4xf32>
    %233 = arith.mulf %230, %45 : vector<16x2xf32>
    %234 = arith.mulf %231, %46 : vector<16x2xf32>
    %235 = arith.subf %233, %234 : vector<16x2xf32>
    %236 = arith.mulf %231, %45 : vector<16x2xf32>
    %237 = arith.mulf %230, %46 : vector<16x2xf32>
    %238 = arith.addf %236, %237 : vector<16x2xf32>
    %239 = tpu.concatenate %235, %238, %232 in 1 : vector<16x2xf32>, vector<16x2xf32>, vector<16x4xf32> -> vector<16x8xf32>
    %240 = vector.extract_strided_slice %44 {offsets = [0, 48], sizes = [16, 8], strides = [1, 1]} : vector<16x96xf32> to vector<16x8xf32>
    %cst_60 = arith.constant dense<0.000000e+00> : vector<16xf32>
    %241 = vector.multi_reduction <add>, %240, %cst_60 [1] : vector<16x8xf32> to vector<16xf32>
    %242 = vector.shape_cast %241 : vector<16xf32> to vector<16x1xf32>
    %cst_61 = arith.constant 8.000000e+00 : f32
    %243 = vector.broadcast %cst_61 : f32 to vector<16x1xf32>
    %244 = arith.divf %242, %243 : vector<16x1xf32>
    %245 = vector.broadcast %244 : vector<16x1xf32> to vector<16x8xf32>
    %246 = arith.subf %240, %245 : vector<16x8xf32>
    %247 = arith.mulf %246, %246 : vector<16x8xf32>
    %cst_62 = arith.constant dense<0.000000e+00> : vector<16xf32>
    %248 = vector.multi_reduction <add>, %247, %cst_62 [1] : vector<16x8xf32> to vector<16xf32>
    %249 = vector.shape_cast %248 : vector<16xf32> to vector<16x1xf32>
    %cst_63 = arith.constant 8.000000e+00 : f32
    %250 = vector.broadcast %cst_63 : f32 to vector<16x1xf32>
    %251 = arith.divf %249, %250 : vector<16x1xf32>
    %252 = vector.broadcast %244 : vector<16x1xf32> to vector<16x8xf32>
    %253 = arith.subf %240, %252 : vector<16x8xf32>
    %cst_64 = arith.constant 9.99999997E-7 : f32
    %254 = vector.broadcast %cst_64 : f32 to vector<16x1xf32>
    %255 = arith.addf %251, %254 : vector<16x1xf32>
    %256 = math.rsqrt %255 : vector<16x1xf32>
    %257 = vector.broadcast %256 : vector<16x1xf32> to vector<16x8xf32>
    %258 = arith.mulf %253, %257 : vector<16x8xf32>
    %259 = vector.broadcast %48 : vector<1x8xf32> to vector<16x8xf32>
    %260 = arith.mulf %258, %259 : vector<16x8xf32>
    %261 = vector.extract_strided_slice %260 {offsets = [0, 0], sizes = [16, 2], strides = [1, 1]} : vector<16x8xf32> to vector<16x2xf32>
    %262 = vector.extract_strided_slice %260 {offsets = [0, 2], sizes = [16, 2], strides = [1, 1]} : vector<16x8xf32> to vector<16x2xf32>
    %263 = vector.extract_strided_slice %260 {offsets = [0, 4], sizes = [16, 4], strides = [1, 1]} : vector<16x8xf32> to vector<16x4xf32>
    %264 = arith.mulf %261, %45 : vector<16x2xf32>
    %265 = arith.mulf %262, %46 : vector<16x2xf32>
    %266 = arith.subf %264, %265 : vector<16x2xf32>
    %267 = arith.mulf %262, %45 : vector<16x2xf32>
    %268 = arith.mulf %261, %46 : vector<16x2xf32>
    %269 = arith.addf %267, %268 : vector<16x2xf32>
    %270 = tpu.concatenate %266, %269, %263 in 1 : vector<16x2xf32>, vector<16x2xf32>, vector<16x4xf32> -> vector<16x8xf32>
    %271 = vector.extract_strided_slice %44 {offsets = [0, 80], sizes = [16, 8], strides = [1, 1]} : vector<16x96xf32> to vector<16x8xf32>
    %272 = arith.truncf %239 : vector<16x8xf32> to vector<16x8xbf16>
    %273 = arith.truncf %270 : vector<16x8xf32> to vector<16x8xbf16>
    %cst_65 = arith.constant dense<0.000000e+00> : vector<16x16xf32>
    %274 = tpu.matmul %272, %273, %cst_65 {dimension_numbers = #tpu.dot_dimension_numbers<[1], [1], [0], [0], [0, 0, 1, 0], [], []>} : vector<16x8xbf16>, vector<16x8xbf16>, vector<16x16xf32> -> vector<16x16xf32>
    %cst_66 = arith.constant dense<0xFF800000> : vector<16xf32>
    %275 = vector.multi_reduction <maximumf>, %274, %cst_66 [1] : vector<16x16xf32> to vector<16xf32>
    %276 = vector.shape_cast %275 : vector<16xf32> to vector<16x1xf32>
    %277 = vector.broadcast %276 : vector<16x1xf32> to vector<16x16xf32>
    %278 = arith.subf %274, %277 : vector<16x16xf32>
    %279 = math.exp %278 : vector<16x16xf32>
    %cst_67 = arith.constant dense<0.000000e+00> : vector<16xf32>
    %280 = vector.multi_reduction <add>, %279, %cst_67 [1] : vector<16x16xf32> to vector<16xf32>
    %281 = vector.shape_cast %280 : vector<16xf32> to vector<16x1xf32>
    %282 = tpu.reciprocal %281 {approx = true} : vector<16x1xf32> -> vector<16x1xf32>
    %283 = vector.broadcast %282 : vector<16x1xf32> to vector<16x16xf32>
    %284 = arith.mulf %279, %283 : vector<16x16xf32>
    %285 = arith.truncf %284 : vector<16x16xf32> to vector<16x16xbf16>
    %286 = arith.truncf %271 : vector<16x8xf32> to vector<16x8xbf16>
    %cst_68 = arith.constant dense<0.000000e+00> : vector<16x8xf32>
    %287 = tpu.matmul %285, %286, %cst_68 {dimension_numbers = #tpu.dot_dimension_numbers<[1], [0], [0], [1], [0, 0, 1, 1], [], []>} : vector<16x16xbf16>, vector<16x8xbf16>, vector<16x8xf32> -> vector<16x8xf32>
    %288 = arith.truncf %287 : vector<16x8xf32> to vector<16x8xbf16>
    %289 = vector.extract_strided_slice %44 {offsets = [0, 24], sizes = [16, 8], strides = [1, 1]} : vector<16x96xf32> to vector<16x8xf32>
    %cst_69 = arith.constant dense<0.000000e+00> : vector<16xf32>
    %290 = vector.multi_reduction <add>, %289, %cst_69 [1] : vector<16x8xf32> to vector<16xf32>
    %291 = vector.shape_cast %290 : vector<16xf32> to vector<16x1xf32>
    %cst_70 = arith.constant 8.000000e+00 : f32
    %292 = vector.broadcast %cst_70 : f32 to vector<16x1xf32>
    %293 = arith.divf %291, %292 : vector<16x1xf32>
    %294 = vector.broadcast %293 : vector<16x1xf32> to vector<16x8xf32>
    %295 = arith.subf %289, %294 : vector<16x8xf32>
    %296 = arith.mulf %295, %295 : vector<16x8xf32>
    %cst_71 = arith.constant dense<0.000000e+00> : vector<16xf32>
    %297 = vector.multi_reduction <add>, %296, %cst_71 [1] : vector<16x8xf32> to vector<16xf32>
    %298 = vector.shape_cast %297 : vector<16xf32> to vector<16x1xf32>
    %cst_72 = arith.constant 8.000000e+00 : f32
    %299 = vector.broadcast %cst_72 : f32 to vector<16x1xf32>
    %300 = arith.divf %298, %299 : vector<16x1xf32>
    %301 = vector.broadcast %293 : vector<16x1xf32> to vector<16x8xf32>
    %302 = arith.subf %289, %301 : vector<16x8xf32>
    %cst_73 = arith.constant 9.99999997E-7 : f32
    %303 = vector.broadcast %cst_73 : f32 to vector<16x1xf32>
    %304 = arith.addf %300, %303 : vector<16x1xf32>
    %305 = math.rsqrt %304 : vector<16x1xf32>
    %306 = vector.broadcast %305 : vector<16x1xf32> to vector<16x8xf32>
    %307 = arith.mulf %302, %306 : vector<16x8xf32>
    %308 = vector.broadcast %47 : vector<1x8xf32> to vector<16x8xf32>
    %309 = arith.mulf %307, %308 : vector<16x8xf32>
    %310 = vector.extract_strided_slice %309 {offsets = [0, 0], sizes = [16, 2], strides = [1, 1]} : vector<16x8xf32> to vector<16x2xf32>
    %311 = vector.extract_strided_slice %309 {offsets = [0, 2], sizes = [16, 2], strides = [1, 1]} : vector<16x8xf32> to vector<16x2xf32>
    %312 = vector.extract_strided_slice %309 {offsets = [0, 4], sizes = [16, 4], strides = [1, 1]} : vector<16x8xf32> to vector<16x4xf32>
    %313 = arith.mulf %310, %45 : vector<16x2xf32>
    %314 = arith.mulf %311, %46 : vector<16x2xf32>
    %315 = arith.subf %313, %314 : vector<16x2xf32>
    %316 = arith.mulf %311, %45 : vector<16x2xf32>
    %317 = arith.mulf %310, %46 : vector<16x2xf32>
    %318 = arith.addf %316, %317 : vector<16x2xf32>
    %319 = tpu.concatenate %315, %318, %312 in 1 : vector<16x2xf32>, vector<16x2xf32>, vector<16x4xf32> -> vector<16x8xf32>
    %320 = vector.extract_strided_slice %44 {offsets = [0, 56], sizes = [16, 8], strides = [1, 1]} : vector<16x96xf32> to vector<16x8xf32>
    %cst_74 = arith.constant dense<0.000000e+00> : vector<16xf32>
    %321 = vector.multi_reduction <add>, %320, %cst_74 [1] : vector<16x8xf32> to vector<16xf32>
    %322 = vector.shape_cast %321 : vector<16xf32> to vector<16x1xf32>
    %cst_75 = arith.constant 8.000000e+00 : f32
    %323 = vector.broadcast %cst_75 : f32 to vector<16x1xf32>
    %324 = arith.divf %322, %323 : vector<16x1xf32>
    %325 = vector.broadcast %324 : vector<16x1xf32> to vector<16x8xf32>
    %326 = arith.subf %320, %325 : vector<16x8xf32>
    %327 = arith.mulf %326, %326 : vector<16x8xf32>
    %cst_76 = arith.constant dense<0.000000e+00> : vector<16xf32>
    %328 = vector.multi_reduction <add>, %327, %cst_76 [1] : vector<16x8xf32> to vector<16xf32>
    %329 = vector.shape_cast %328 : vector<16xf32> to vector<16x1xf32>
    %cst_77 = arith.constant 8.000000e+00 : f32
    %330 = vector.broadcast %cst_77 : f32 to vector<16x1xf32>
    %331 = arith.divf %329, %330 : vector<16x1xf32>
    %332 = vector.broadcast %324 : vector<16x1xf32> to vector<16x8xf32>
    %333 = arith.subf %320, %332 : vector<16x8xf32>
    %cst_78 = arith.constant 9.99999997E-7 : f32
    %334 = vector.broadcast %cst_78 : f32 to vector<16x1xf32>
    %335 = arith.addf %331, %334 : vector<16x1xf32>
    %336 = math.rsqrt %335 : vector<16x1xf32>
    %337 = vector.broadcast %336 : vector<16x1xf32> to vector<16x8xf32>
    %338 = arith.mulf %333, %337 : vector<16x8xf32>
    %339 = vector.broadcast %48 : vector<1x8xf32> to vector<16x8xf32>
    %340 = arith.mulf %338, %339 : vector<16x8xf32>
    %341 = vector.extract_strided_slice %340 {offsets = [0, 0], sizes = [16, 2], strides = [1, 1]} : vector<16x8xf32> to vector<16x2xf32>
    %342 = vector.extract_strided_slice %340 {offsets = [0, 2], sizes = [16, 2], strides = [1, 1]} : vector<16x8xf32> to vector<16x2xf32>
    %343 = vector.extract_strided_slice %340 {offsets = [0, 4], sizes = [16, 4], strides = [1, 1]} : vector<16x8xf32> to vector<16x4xf32>
    %344 = arith.mulf %341, %45 : vector<16x2xf32>
    %345 = arith.mulf %342, %46 : vector<16x2xf32>
    %346 = arith.subf %344, %345 : vector<16x2xf32>
    %347 = arith.mulf %342, %45 : vector<16x2xf32>
    %348 = arith.mulf %341, %46 : vector<16x2xf32>
    %349 = arith.addf %347, %348 : vector<16x2xf32>
    %350 = tpu.concatenate %346, %349, %343 in 1 : vector<16x2xf32>, vector<16x2xf32>, vector<16x4xf32> -> vector<16x8xf32>
    %351 = vector.extract_strided_slice %44 {offsets = [0, 88], sizes = [16, 8], strides = [1, 1]} : vector<16x96xf32> to vector<16x8xf32>
    %352 = arith.truncf %319 : vector<16x8xf32> to vector<16x8xbf16>
    %353 = arith.truncf %350 : vector<16x8xf32> to vector<16x8xbf16>
    %cst_79 = arith.constant dense<0.000000e+00> : vector<16x16xf32>
    %354 = tpu.matmul %352, %353, %cst_79 {dimension_numbers = #tpu.dot_dimension_numbers<[1], [1], [0], [0], [0, 0, 1, 0], [], []>} : vector<16x8xbf16>, vector<16x8xbf16>, vector<16x16xf32> -> vector<16x16xf32>
    %cst_80 = arith.constant dense<0xFF800000> : vector<16xf32>
    %355 = vector.multi_reduction <maximumf>, %354, %cst_80 [1] : vector<16x16xf32> to vector<16xf32>
    %356 = vector.shape_cast %355 : vector<16xf32> to vector<16x1xf32>
    %357 = vector.broadcast %356 : vector<16x1xf32> to vector<16x16xf32>
    %358 = arith.subf %354, %357 : vector<16x16xf32>
    %359 = math.exp %358 : vector<16x16xf32>
    %cst_81 = arith.constant dense<0.000000e+00> : vector<16xf32>
    %360 = vector.multi_reduction <add>, %359, %cst_81 [1] : vector<16x16xf32> to vector<16xf32>
    %361 = vector.shape_cast %360 : vector<16xf32> to vector<16x1xf32>
    %362 = tpu.reciprocal %361 {approx = true} : vector<16x1xf32> -> vector<16x1xf32>
    %363 = vector.broadcast %362 : vector<16x1xf32> to vector<16x16xf32>
    %364 = arith.mulf %359, %363 : vector<16x16xf32>
    %365 = arith.truncf %364 : vector<16x16xf32> to vector<16x16xbf16>
    %366 = arith.truncf %351 : vector<16x8xf32> to vector<16x8xbf16>
    %cst_82 = arith.constant dense<0.000000e+00> : vector<16x8xf32>
    %367 = tpu.matmul %365, %366, %cst_82 {dimension_numbers = #tpu.dot_dimension_numbers<[1], [0], [0], [1], [0, 0, 1, 1], [], []>} : vector<16x16xbf16>, vector<16x8xbf16>, vector<16x8xf32> -> vector<16x8xf32>
    %368 = arith.truncf %367 : vector<16x8xf32> to vector<16x8xbf16>
    %369 = tpu.concatenate %128, %208, %288, %368 in 1 : vector<16x8xbf16>, vector<16x8xbf16>, vector<16x8xbf16>, vector<16x8xbf16> -> vector<16x32xbf16>
    %c0_83 = arith.constant 0 : index
    %c0_84 = arith.constant 0 : index
    %370 = vector.load %arg10[%c0_83, %c0_84] : memref<32x32xbf16, #tpu.memory_space<vmem>>, vector<32x32xbf16>
    %cst_85 = arith.constant dense<0.000000e+00> : vector<16x32xf32>
    %371 = tpu.matmul %369, %370, %cst_85 {dimension_numbers = #tpu.dot_dimension_numbers<[1], [0], [0], [1], [0, 0, 1, 1], [], []>} : vector<16x32xbf16>, vector<32x32xbf16>, vector<16x32xf32> -> vector<16x32xf32>
    %372 = vector.broadcast %15 : vector<1x32xf32> to vector<16x32xf32>
    %373 = arith.mulf %371, %372 : vector<16x32xf32>
    %c0_86 = arith.constant 0 : index
    %c0_87 = arith.constant 0 : index
    %c0_88 = arith.constant 0 : index
    %374 = vector.load %arg11[%c0_86, %c0_87, %c0_88] : memref<1x16x32xf32, #tpu.memory_space<vmem>>, vector<1x16x32xf32>
    %375 = vector.shape_cast %374 : vector<1x16x32xf32> to vector<16x32xf32>
    %376 = vector.shape_cast %373 : vector<16x32xf32> to vector<1x16x32xf32>
    tpu.vector_store %arg11[%c0_86, %c0_87, %c0_88], %376 {strides = array<i32>} : memref<1x16x32xf32, #tpu.memory_space<vmem>>, vector<1x16x32xf32>,
    return
  }
  func.func @transform_0(%arg0: i32) -> (i32, i32, i32) {
    %c0_i32 = arith.constant 0 : i32
    %c0_i32_0 = arith.constant 0 : i32
    %c0_i32_1 = arith.constant 0 : i32
    return %arg0, %c0_i32, %c0_i32_0 : i32, i32, i32
  }
  func.func @transform_1(%arg0: i32) -> (i32, i32, i32) {
    %c0_i32 = arith.constant 0 : i32
    %c0_i32_0 = arith.constant 0 : i32
    %c0_i32_1 = arith.constant 0 : i32
    return %arg0, %c0_i32, %c0_i32_0 : i32, i32, i32
  }
  func.func @transform_2(%arg0: i32) -> (i32, i32) {
    %c0_i32 = arith.constant 0 : i32
    %c0_i32_0 = arith.constant 0 : i32
    %c0_i32_1 = arith.constant 0 : i32
    return %c0_i32, %c0_i32_0 : i32, i32
  }
  func.func @transform_3(%arg0: i32) -> (i32, i32) {
    %c0_i32 = arith.constant 0 : i32
    %c0_i32_0 = arith.constant 0 : i32
    %c0_i32_1 = arith.constant 0 : i32
    return %c0_i32, %c0_i32_0 : i32, i32
  }
  func.func @transform_4(%arg0: i32) -> (i32, i32) {
    %c0_i32 = arith.constant 0 : i32
    %c0_i32_0 = arith.constant 0 : i32
    %c0_i32_1 = arith.constant 0 : i32
    return %c0_i32, %c0_i32_0 : i32, i32
  }
  func.func @transform_5(%arg0: i32) -> (i32, i32) {
    %c0_i32 = arith.constant 0 : i32
    %c0_i32_0 = arith.constant 0 : i32
    %c0_i32_1 = arith.constant 0 : i32
    return %c0_i32, %c0_i32_0 : i32, i32
  }
  func.func @transform_6(%arg0: i32) -> (i32, i32) {
    %c0_i32 = arith.constant 0 : i32
    %c0_i32_0 = arith.constant 0 : i32
    %c0_i32_1 = arith.constant 0 : i32
    return %c0_i32, %c0_i32_0 : i32, i32
  }
  func.func @transform_7(%arg0: i32) -> (i32, i32) {
    %c0_i32 = arith.constant 0 : i32
    %c0_i32_0 = arith.constant 0 : i32
    %c0_i32_1 = arith.constant 0 : i32
    return %c0_i32, %c0_i32_0 : i32, i32
  }
  func.func @transform_8(%arg0: i32) -> (i32, i32) {
    %c0_i32 = arith.constant 0 : i32
    %c0_i32_0 = arith.constant 0 : i32
    %c0_i32_1 = arith.constant 0 : i32
    return %c0_i32, %c0_i32_0 : i32, i32
  }
  func.func @transform_9(%arg0: i32) -> (i32, i32) {
    %c0_i32 = arith.constant 0 : i32
    %c0_i32_0 = arith.constant 0 : i32
    %c0_i32_1 = arith.constant 0 : i32
    return %c0_i32, %c0_i32_0 : i32, i32
  }
  func.func @transform_10(%arg0: i32) -> (i32, i32, i32) {
    %c0_i32 = arith.constant 0 : i32
    %c0_i32_0 = arith.constant 0 : i32
    %c0_i32_1 = arith.constant 0 : i32
    return %arg0, %c0_i32, %c0_i32_0 : i32, i32, i32
  }
}

</mosaic_0001>

<bundles_post_ra>
// kernel: tpu_custom_call.1
= control target key start
LH: loop header
LB: loop body
LE: loop exit
PB: predicated region body
PF: predicated region fallthrough
CT: control target
= control target key end

     0   :  { %s4078_s0 = inlined_call_operand.vmem [shape: f32[2,16,32], index: 0, kind: input, shape index: {}]   ;;  %s4079_s1 = inlined_call_operand.vmem [shape: f32[2,1,32], index: 1, kind: input, shape index: {}]   ;;  %s4080_s2 = inlined_call_operand.hbm [shape: bf16[32,96], index: 2, kind: input, shape index: {}]   ;;  %s4081_s3 = inlined_call_operand.hbm [shape: f32[1,96], index: 3, kind: input, shape index: {}]   ;;  %s4082_s4 = inlined_call_operand.vmem [shape: bf16[32,96], index: 4, kind: input, shape index: {}]   ;;  %s4083_s5 = inlined_call_operand.hbm [shape: f32[1,8], index: 5, kind: input, shape index: {}]   ;;  %s4084_s6 = inlined_call_operand.hbm [shape: f32[1,8], index: 6, kind: input, shape index: {}]   ;;  %s4085_s7 = inlined_call_operand.vmem [shape: f32[16,2], index: 7, kind: input, shape index: {}]   ;;  %s4086_s8 = inlined_call_operand.vmem [shape: f32[16,2], index: 8, kind: input, shape index: {}]   ;;  %s4087_s9 = inlined_call_operand.vmem [shape: bf16[32,32], index: 9, kind: input, shape index: {}]   ;;  %s4088_s10 = inlined_call_operand.hbm [shape: f32[2,16,32], index: 10, kind: output, shape index: {}]  }
   0x1   :  { %4119 = sst [smem:[#allocation50_spill]] %s4081_s3 }
   0x2   :  { %15 = vsyncpa [#allocation3], 0 }
   0x3   :  { %16 = vsyncpa [#allocation6], 0 }
   0x4   :  { %17 = vsyncpa [#allocation9], 0 }
   0x5   :  { %18 = vsyncpa [#allocation4], 0 }
   0x6   :  { %20 = vsyncpa [#allocation4 + $0x1], 0  ;;  %s2982_s13 = smov 0   ;;  %s2984_s14 = smov 0  }
   0x7   :  { %s2986_s15 = smov 0   ;;  %s2988_s16 = smov 0  }
   0x8 LB: > { %4120 = sst [smem:[#allocation15_spill]] %s2887_s15  ;;  %s3003_s17 = sadd.s32 4294967295, %s2891_s16   ;;  %s2891_s16 = sphi %s2988_s16, %s4212_s16   ;;  %s2887_s15 = sphi %s2986_s15, %s4214_s15   ;;  %s2883_s14 = sphi %s2984_s14, %s4216_s14   ;;  %s2879_s13 = sphi %s2982_s13, %s4215_s13  }
   0x9   : > { %s2270_s18 = sadd.s32 4294967294, %s2891_s16   ;;  %s3007_s19 = sadd.s32 1, %s2891_s16  }
   0xa   : > { %4121 = sst [smem:[#allocation16_spill]] %s3007_s19  ;;  %s253_s20 = sadd.s32 1, %s2887_s15 }
   0xb   : > { %s250_s21 = ssub.s32 %s2891_s16, %s3007_s19  ;;  %p263_p0 = scmp.ne.s32.totalorder %s2887_s15, %s2883_s14 }
   0xc   : > { %p251_p1 = scmp.eq.s32.totalorder %s250_s21, 0  ;;  %p264_p2 = scmp.eq.s32.totalorder %s3003_s17, 1 }
   0xd   : > { %p269_p3 = scmp.ne.s32.totalorder %s2883_s14, %s2879_s13  ;;  %p270_p4 = scmp.eq.s32.totalorder %s2270_s18, 1 }
   0xe   : > { %s3018_s22 = scalar_select %p251_p1, %s2887_s15, %s253_s20  }
   0xf   : > { %p3020_p5 = por %p264_p2, %p263_p0  ;;  %p3024_p6 = por %p270_p4, %p269_p3 }
  0x10   : > { %4122 = sst [smem:[#allocation17_spill]] %s3018_s22  ;;  %p2271_p7 = scmp.ge.s32.totalorder %s2891_s16, 1 }
  0x11   : > { %s4123_s23 = scalar_select %p3020_p5, 1, 0 }
  0x12   : > { %s4124_s24 = scalar_select %p3024_p6, 1, 0 }
  0x13   : > { %p277_p8 = scmp.lt.s32.totalorder %s2891_s16, 3  ;;  %p4090_p9 = scmp.eq.s32.totalorder %s3003_s17, 0 }
  0x14   : > { %4125 = sst [smem:[#allocation18_spill]] %s4124_s24  ;;  %s2893_s26 = smov [#allocation5]  }
  0x15   : > { %p3031_p10 = pnand %p2271_p7, %p277_p8  ;;  %s303_s27 = sshll.u32 %s2893_s26, 4  ;;  %s304_s27 = int_to_ptr.vmem [resolvable:$true] %s303_s27 }
  0x16   : > { %s2894_s28 = smov [#allocation2]   ;;  %s2895_s11 = smov [#allocation7]  }
  0x17   : > { %s4126_s25 = scalar_select %p3031_p10, 1, 0 }
  0x18   : > { %p2427_p11 = pneg %p3031_p10  ;;  %s289_s29 = sshll.u32 %s2894_s28, 4  ;;  %s3043_s29 = int_to_ptr.vmem [resolvable:$true] %s289_s29 }
  0x19   : > { %s3045_s12 = sshll.u32 %s2895_s11, 4  ;;  %s4128_s3 = sld [smem:[#allocation50_spill]]  ;;  %s318_s12 = int_to_ptr.vmem [resolvable:$true] %s3045_s12 }
  0x1a   : > { %p3039_p12 = pnand %p4090_p9, %p2427_p11 }
  0x1c   : > { %p3055_p0 = pneg %p3039_p12 }
  0x1f   : > { %s2705_s21 = scalar_lea.hbm %s4128_s3, 16 }
  0x20   : > { %p2706_p13 = scmp.ne.s32.totalorder %s4128_s3, %s2705_s21  ;;  %p2712_p3 = scmp.lt.u32.totalorder %s2705_s21, %s4128_s3 }
  0x22   : > { %p2708_p1 = pnand %p3055_p0, %p2706_p13 }
  0x24   : > { %p2709_p2 = pneg %p2708_p1 }
  0x26   : > { %p2714_p4 = pnand %p2712_p3, %p2709_p2 }
  0x28   : > { %2717 = shalt.err (!%p2714_p4)
}
  0x29   : > { %s2718_s18 = scalar_lea.vmem %s304_s27, 16  ;;  %s2725_s22 = scalar_lea.vmem %s304_s27, 32 }
  0x2a   : > { %p2719_p7 = scmp.ne.s32.totalorder %s304_s27, %s2718_s18  ;;  %p2726_p9 = scmp.lt.s32.totalorder %s304_s27, %s304_s27 }
  0x2b   : > { %p2727_p6 = scmp.lt.s32.totalorder %s2725_s22, %s2718_s18 }
  0x2c   : > { %p2721_p8 = pnand %p2719_p7, %p3055_p0 }
  0x2d   : > { %p2728_p5 = por %p2727_p6, %p2726_p9 }
  0x2e   : > { %p2722_p11 = pneg %p2721_p8 }
  0x30   : > { %p2729_p10 = pnand %p2728_p5, %p2722_p11 }
  0x32   : > { %2732 = shalt.err (!%p2729_p10)
}
  0x33   : > { %2433 = dma.hbm_to_vmem [thread:$0]  (!%p3039_p12), %s4128_s3, 16, %s304_s27, [#allocation6]  }
  0x34   : > { %s2733_s11 = scalar_lea.hbm %s4080_s2, 256 }
  0x35   : > { %p2734_p13 = scmp.ne.s32.totalorder %s4080_s2, %s2733_s11  ;;  %p2740_p5 = scmp.lt.u32.totalorder %s2733_s11, %s4080_s2 }
  0x37   : > { %p2736_p1 = pnand %p2734_p13, %p3055_p0 }
  0x39   : > { %p2737_p6 = pneg %p2736_p1 }
  0x3b   : > { %p2742_p9 = pnand %p2740_p5, %p2737_p6 }
  0x3d   : > { %2745 = shalt.err (!%p2742_p9)
}
  0x3e   : > { %s2746_s27 = scalar_lea.vmem %s3043_s29, 256  ;;  %p2754_p4 = scmp.lt.s32.totalorder %s3043_s29, %s3043_s29 }
  0x3f   : > { %p2747_p10 = scmp.ne.s32.totalorder %s3043_s29, %s2746_s27  ;;  %p2755_p7 = scmp.lt.s32.totalorder %s2746_s27, %s2746_s27 }
  0x41   : > { %p2749_p2 = pnand %p2747_p10, %p3055_p0  ;;  %p2756_p8 = por %p2755_p7, %p2754_p4 }
  0x43   : > { %p2750_p3 = pneg %p2749_p2 }
  0x45   : > { %p2757_p11 = pnand %p2756_p8, %p2750_p3 }
  0x47   : > { %2760 = shalt.err (!%p2757_p11)
}
  0x48   : > { %s2896_s19 = smov 64   ;;  %s2897_s24 = smov 4  }
  0x49   : > { %2430 = dma.hbm_to_vmem [thread:$0]  (!%p3039_p12), %s4080_s2, 256, %s3043_s29, [#allocation3], %s2896_s19, %s2896_s19, %s2897_s24  }
  0x4a   : > { %s2761_s11 = scalar_lea.hbm %s4083_s5, 16 }
  0x4b   : > { %p2762_p13 = scmp.ne.s32.totalorder %s4083_s5, %s2761_s11  ;;  %p2768_p5 = scmp.lt.u32.totalorder %s2761_s11, %s4083_s5 }
  0x4d   : > { %p2764_p1 = pnand %p2762_p13, %p3055_p0 }
  0x4f   : > { %p2765_p6 = pneg %p2764_p1 }
  0x51   : > { %p2770_p9 = pnand %p2768_p5, %p2765_p6 }
  0x53   : > { %2773 = shalt.err (!%p2770_p9)
}
  0x54   : > { %s2774_s20 = scalar_lea.vmem %s318_s12, 16  ;;  %s2781_s29 = scalar_lea.vmem %s318_s12, 32 }
  0x55   : > { %p2775_p10 = scmp.ne.s32.totalorder %s318_s12, %s2774_s20  ;;  %p2782_p4 = scmp.lt.s32.totalorder %s318_s12, %s318_s12 }
  0x56   : > { %p2783_p7 = scmp.lt.s32.totalorder %s2781_s29, %s2774_s20 }
  0x57   : > { %p2777_p2 = pnand %p2775_p10, %p3055_p0 }
  0x58   : > { %p2784_p8 = por %p2783_p7, %p2782_p4 }
  0x59   : > { %p2778_p3 = pneg %p2777_p2 }
  0x5b   : > { %p2785_p11 = pnand %p2784_p8, %p2778_p3 }
  0x5d   : > { %2788 = shalt.err (!%p2785_p11)
}
  0x5e   : > { %2436 = dma.hbm_to_vmem [thread:$0]  (!%p3039_p12), %s4083_s5, 16, %s318_s12, [#allocation6]  }
  0x5f   : > { %s2898_s3 = smov [#allocation8]   ;;  %s2789_s11 = scalar_lea.hbm %s4084_s6, 16 }
  0x60   : > { %s328_s26 = sshll.u32 %s2898_s3, 4  ;;  %p2790_p13 = scmp.ne.s32.totalorder %s4084_s6, %s2789_s11  ;;  %s329_s26 = int_to_ptr.vmem [resolvable:$true] %s328_s26 }
  0x61   : > { %p2796_p5 = scmp.lt.u32.totalorder %s2789_s11, %s4084_s6 }
  0x62   : > { %p2792_p1 = pnand %p2790_p13, %p3055_p0 }
  0x64   : > { %p2793_p6 = pneg %p2792_p1 }
  0x66   : > { %p2798_p9 = pnand %p2796_p5, %p2793_p6 }
  0x68   : > { %2801 = shalt.err (!%p2798_p9)
}
  0x69   : > { %s2802_s12 = scalar_lea.vmem %s329_s26, 16  ;;  %s2809_s29 = scalar_lea.vmem %s329_s26, 32 }
  0x6a   : > { %p2803_p10 = scmp.ne.s32.totalorder %s329_s26, %s2802_s12  ;;  %p2810_p4 = scmp.lt.s32.totalorder %s329_s26, %s329_s26 }
  0x6b   : > { %p2811_p7 = scmp.lt.s32.totalorder %s2809_s29, %s2802_s12 }
  0x6c   : > { %p2805_p2 = pnand %p2803_p10, %p3055_p0 }
  0x6d   : > { %p2812_p8 = por %p2811_p7, %p2810_p4 }
  0x6e   : > { %p2806_p3 = pneg %p2805_p2 }
  0x70   : > { %p2813_p11 = pnand %p2812_p8, %p2806_p3 }
  0x72   : > { %2816 = shalt.err (!%p2813_p11)
}
  0x73   : > { %2439 = dma.hbm_to_vmem [thread:$0]  (!%p3039_p12), %s4084_s6, 16, %s329_s26, [#allocation9]  }
  0x74   : > { %p4130_p13 = scmp.ne.s32.totalorder %s4126_s25, 0 }
  0x76   : > { %364 = sbr.rel (%p4130_p13) target bundleno = 2806 (0xaf6), region = 60 }
  0x7d   : > { %p4131_p1 = scmp.eq.s32.totalorder %s3003_s17, 0 }
  0x7f   : > { %2862 = dma.done.wait (%p4131_p1), [#allocation3], 256   ;;  %p4132_p0 = pmov %p4131_p1 }
  0x81   : > { %2864 = vsyncadd (%p4132_p0), [#allocation3], 4294967040  ;;  %p4133_p6 = pmov %p4132_p0 }
  0x82   : > { %p4134_p5 = pmov %p4132_p0 }
  0x83   : > { %2866 = dma.done.wait (%p4133_p6), [#allocation6], 32  }
  0x84   : > { %2868 = vsyncadd (%p4134_p5), [#allocation6], 4294967264  ;;  %p4135_p9 = pmov %p4132_p0 }
  0x85   : > { %p4136_p12 = pmov %p4132_p0 }
  0x86   : > { %2870 = dma.done.wait (%p4135_p9), [#allocation9], 16  }
  0x87   : > { %2872 = vsyncadd (%p4136_p12), [#allocation9], 4294967280  ;;  %p417_p10 = scmp.lt.s32.totalorder %s3003_s17, 1  ;;  %v4109_v0 = vmov 0.0   ;;  %vm2900_vm0 = vmmov 0   ;;  %vm452_vm1 = vcmask 261120   ;;  %v526_v25 = vlaneseq }
  0x88   : > { %2337 = vmatprep.subr.bf16.mxu0 %v4109_v0  ;;  %2341 = vmatprep.mubr.msk.bf16.mxu0 %vm2900_vm0, %v4109_v0  ;;  %v2623_v6 = vld [vmem:[#allocation2] sm:$0xff]   ;;  %v2624_v8 = vld [vmem:[#allocation2 + $0x8] sm:$0xff]   ;;  %v439_v28 = vld [vmem:[#allocation5] sm:$0x1]  ;;  %s2901_s12 = smov 32   ;;  %s4111_s29 = smov 96  }
  0x89   : > { %s418_s25 = scalar_select %p417_p10, %s3003_s17, 1  ;;  %2345 = vmatprep.subr.bf16.mxu1 %v4109_v0  ;;  %2349 = vmatprep.mubr.msk.bf16.mxu1 %vm2900_vm0, %v4109_v0  ;;  %v2625_v24 = vld [vmem:[%s4082_s4] sm:$0xff]   ;;  %v527_v26 = vshrl.u32 %v526_v25, 7  ;;  %v2626_v27 = vld [vmem:[%s4082_s4 + $0x8] sm:$0xff]   ;;  %v2293_v37 = vld [vmem:[#allocation8] ss:$0 sm:$0xff] }
  0x8a   : > { %2338 = vmatpush3.bf16.msra.mxu0 %v2623_v6  ;;  %2346 = vmatpush3.bf16.msra.mxu1 %v2625_v24  ;;  %v3191_v39 = vld [vmem:[%s4086_s8 + $0x8] sm:$0xff]  ;;  %v3196_v40 = vld [vmem:[%s4086_s8] sm:$0xff]  ;;  %s4104_s28 = smov 34   ;;  %s4102_s3 = smov 42   ;;  %v3218_v41 = vld [vmem:[#allocation7] ss:$0 sm:$0xff] }
  0x8b   : > { %s2310_s30 = sshll.u32 %s418_s25, 4  ;;  %s424_s26 = scalar_lea.vmem %s4079_s1, %s418_s25  ;;  %2339 = vmatprep.subr.bf16.mxu0 %v4109_v0  ;;  %2347 = vmatprep.subr.bf16.mxu1 %v4109_v0  ;;  %v528_v29 = vsub.s32 0, %v527_v26  ;;  %v3250_v42 = vld [vmem:[%s4085_s7] sm:$0xff]  ;;  %vm609_vm2 = vcmask 64512   ;;  %v3366_v25 = vld [vmem:[%s4085_s7 + $0x8] sm:$0xff]  ;;  %vm689_vm3 = vcmask 15360  }
  0x8c   : > { %s421_s11 = scalar_lea.vmem %s4078_s0, %s2310_s30  ;;  %v426_v2 = vld [vmem:[%s424_s26] sm:$0x1]  ;;  %s2905_s26 = smov 40   ;;  %vm692_vm4 = vcmask 31744   ;;  %vm876_vm5 = vcmask 130048   ;;  %vm2074_vm6 = vcmask 195584  }
  0x8d   : > { %v496_v1 = vld [vmem:[%s421_s11] sm:$0xff]  ;;  %v497_v3 = vld [vmem:[%s421_s11 + $0x8] sm:$0xff]  ;;  %v2285_v5 = vmul.f32 -1.442695, %v426_v2  ;;  %s2906_s15 = smov 48   ;;  %s4098_s21 = smov 10  }
  0x8e   : > { %v498_v4 = vsel %vm452_vm1, %v496_v1, 0.0  ;;  %v501_v7 = vsel %vm452_vm1, %v497_v3, 0.0  ;;  %2340 = vmatpush3.bf16.msra.mxu0 %v2624_v8  ;;  %2348 = vmatpush3.bf16.msra.mxu1 %v2626_v27  ;;  %s4100_s11 = smov 8   ;;  %s4096_s18 = smov 50  }
  0x8f   : > { %499 = vadd.xlane.f32.xlu0 %v498_v4  ;;  %2629 = vpow2.f32 %v2285_v5  ;;  %2353 = vmatprep.subr.bf16.mxu0 %v4109_v0  ;;  %s4107_s22 = smov 56   ;;  %s2911_s27 = smov 18  }
  0x90   : > { %2359 = vmatprep.subr.bf16.mxu1 %v4109_v0  ;;  %s2912_s20 = smov 16   ;;  %s4105_s19 = smov 58  }
  0x91   : > { %s2914_s24 = smov 26   ;;  %s2915_s25 = smov 24  }
  0x92   : > { %s2917_s30 = smov 120   ;;  %p4209_p3 = scmp.ne.s32.totalorder %s4123_s23, 0 }
  0x93   : > { %502 = vadd.xlane.f32.xlu0 %v501_v7 }
  0x99   : > { %v2630_v9 = vpop.eup %2629 }
  0x9a   : > { %v430_v10 = vadd.f32 1.0, %v2630_v9 }
  0x9c   : > { %2631 = vrcp.f32 %v430_v10 }
  0xa6   : > { %v2632_v11 = vpop.eup %2631 }
  0xa7   : > { %v433_v12 = vmul.f32 %v2632_v11, %v426_v2 }
  0xa9   : > { %v434_v13 = vpack.c.bf16 %v433_v12, %v433_v12 }
  0xab   : > { %2342 = vmatmul.mubr.msk.bf16.vlgmr.msra.gmra.mrb[0].mxu0 %vm452_vm1, %v434_v13 }
  0xac   : > { %2355 = vmatprep.mubr.msk.bf16.mxu0 %vm2900_vm0, %v4109_v0 }
 0x11c   : > { %v500_v14 = vpop.xlane.xlu0 %499 }
 0x11d   : > { %v505_v15 = vmul.f32 0.03125, %v500_v14 }
 0x11f   : > { %v3166_v16 = vsub.f32 %v496_v1, %v505_v15 }
 0x120   : > { %v503_v17 = vpop.xlane.xlu0 %502 }
 0x121   : > { %v506_v18 = vmul.f32 0.03125, %v503_v17  ;;  %v509_v19 = vmul.f32 %v3166_v16, %v3166_v16 }
 0x123   : > { %v3170_v20 = vsub.f32 %v497_v3, %v506_v18  ;;  %v511_v21 = vsel %vm452_vm1, %v509_v19, 0.0 }
 0x124   : > { %512 = vadd.xlane.f32.xlu1 %v511_v21 }
 0x125   : > { %v510_v22 = vmul.f32 %v3170_v20, %v3170_v20 }
 0x127   : > { %v514_v23 = vsel %vm452_vm1, %v510_v22, 0.0 }
 0x128   : > { %515 = vadd.xlane.f32.xlu1 %v514_v23 }
 0x139   : > { %742 = vrot.lane.b32.xlu1 %v2293_v37, %s2901_s12 }
 0x13d   : > { %757 = vrot.lane.b32.xlu1 %v3191_v39, %s4104_s28 }
 0x141   : > { %781 = vrot.lane.b32.xlu1 %v3196_v40, %s2901_s12 }
 0x145   : > { %783 = vrot.lane.b32.xlu1 %v3191_v39, %s2901_s12 }
 0x149   : > { %1115 = vrot.lane.b32.xlu1 %v2293_v37, %s2905_s26 }
 0x14d   : > { %1128 = vrot.lane.b32.xlu1 %v3196_v40, %s4102_s3 }
 0x151   : > { %1154 = vrot.lane.b32.xlu1 %v3196_v40, %s2905_s26 }
 0x155   : > { %990 = vrot.lane.b32.xlu1 %v3218_v41, %s4100_s11 }
 0x159   : > { %1003 = vrot.lane.b32.xlu1 %v3196_v40, %s4098_s21 }
 0x15d   : > { %1029 = vrot.lane.b32.xlu1 %v3196_v40, %s4100_s11 }
 0x161   : > { %1498 = vrot.lane.b32.xlu1 %v3196_v40, %s4096_s18 }
 0x17e   : > { %v490_v30 = vpop.f32.mrb[0].mxu0 }
 0x17f   : > { %v491_v31 = vadd.f32 %v490_v30, %v439_v28  ;;  %v2343_v32 = vpop.f32.mrb[1].mxu0 }
 0x180   : > { %v493_v33 = vpop.f32.mrb[2].mxu0 }
 0x181   : > { %v525_v34 = vadd.f32 1.0, %v491_v31  ;;  %v3184_v35 = vrot.slane %v491_v31, %v528_v29  ;;  %v2344_v36 = vpop.f32.mrb[3].mxu0 }
 0x183   : > { %4137 = vst [vmem:[#allocation19_spill] sm:$0xff] %v3184_v35  ;;  %v529_v38 = vrot.slane %v525_v34, %v528_v29 }
 0x185   : > { %531 = vrot.lane.b32.xlu0 %v529_v38, %s4111_s29 }
 0x189   : > { %755 = vrot.lane.b32.xlu0 %v3196_v40, %s4104_s28 }
 0x18d   : > { %1130 = vrot.lane.b32.xlu0 %v3191_v39, %s4102_s3  ;;  %s2920_s3 = smov 72  }
 0x191   : > { %1156 = vrot.lane.b32.xlu0 %v3191_v39, %s2905_s26 }
 0x195   : > { %1485 = vrot.lane.b32.xlu0 %v2293_v37, %s2906_s15 }
 0x199   : > { %1005 = vrot.lane.b32.xlu0 %v3191_v39, %s4098_s21  ;;  %s2918_s21 = smov 80  }
 0x19d   : > { %1031 = vrot.lane.b32.xlu0 %v3191_v39, %s4100_s11  ;;  %s2919_s11 = smov 112  }
 0x1a1   : > { %1500 = vrot.lane.b32.xlu0 %v3191_v39, %s4096_s18  ;;  %s4113_s18 = smov 88  }
 0x1a5   : > { %1526 = vrot.lane.b32.xlu0 %v3191_v39, %s2906_s15 }
 0x1a9   : > { %1855 = vrot.lane.b32.xlu0 %v2293_v37, %s4107_s22 }
 0x1ad   : > { %1375 = vrot.lane.b32.xlu0 %v3191_v39, %s2911_s27 }
 0x1b1   : > { %1401 = vrot.lane.b32.xlu0 %v3191_v39, %s2912_s20  ;;  %v513_v43 = vpop.xlane.xlu1 %512 }
 0x1b2   : > { %v517_v45 = vmul.f32 0.03125, %v513_v43 }
 0x1b4   : > { %v519_v47 = vadd.f32 1e-06, %v517_v45 }
 0x1b5   : > { %1870 = vrot.lane.b32.xlu0 %v3191_v39, %s4105_s19  ;;  %v516_v44 = vpop.xlane.xlu1 %515 }
 0x1b6   : > { %v518_v46 = vmul.f32 0.03125, %v516_v44  ;;  %2633 = vrsqrt.f32 %v519_v47 }
 0x1b8   : > { %v520_v48 = vadd.f32 1e-06, %v518_v46 }
 0x1b9   : > { %1896 = vrot.lane.b32.xlu0 %v3191_v39, %s4107_s22  ;;  %v3297_v1 = vpop.permute.xlu1 %742 }
 0x1ba   : > { %2635 = vrsqrt.f32 %v520_v48 }
 0x1bd   : > { %1743 = vrot.lane.b32.xlu0 %v3196_v40, %s2914_s24  ;;  %v3301_v3 = vpop.permute.xlu1 %757 }
 0x1c0   : > { %v2634_v49 = vpop.eup %2633 }
 0x1c1   : > { %1769 = vrot.lane.b32.xlu0 %v3196_v40, %s2915_s25  ;;  %v523_v51 = vmul.f32 %v2634_v49, %v3166_v16  ;;  %v3307_v6 = vpop.permute.xlu1 %781 }
 0x1c4   : > { %v2636_v50 = vpop.eup %2635 }
 0x1c5   : > { %747 = vrot.lane.b32.xlu0 %v3250_v42, %s2901_s12  ;;  %v524_v52 = vmul.f32 %v2636_v50, %v3170_v20  ;;  %v3311_v8 = vpop.permute.xlu1 %783 }
 0x1c9   : > { %773 = vrot.lane.b32.xlu0 %v3250_v42, %s4104_s28  ;;  %s2921_s28 = smov 104   ;;  %v3315_v10 = vpop.permute.xlu1 %1115 }
 0x1cd   : > { %v3321_v12 = vpop.permute.xlu1 %1128 }
 0x1d1   : > { %v3327_v14 = vpop.permute.xlu1 %1154 }
 0x1d5   : > { %v3335_v16 = vpop.permute.xlu1 %990 }
 0x1d9   : > { %v3341_v18 = vpop.permute.xlu1 %1003 }
 0x1dd   : > { %v3349_v20 = vpop.permute.xlu1 %1029 }
 0x1e1   : > { %v3355_v22 = vpop.permute.xlu1 %1498 }
 0x1f7   : > { %v532_v53 = vpop.permute.xlu0 %531 }
 0x1f8   : > { %v534_v54 = vmul.f32 %v532_v53, %v523_v51  ;;  %v535_v55 = vmul.f32 %v532_v53, %v524_v52 }
 0x1fa   : > { %v540_v56 = vadd.f32 %v3184_v35, %v534_v54  ;;  %v541_v57 = vadd.f32 %v3184_v35, %v535_v55 }
 0x1fb   : > { %v3303_v4 = vpop.permute.xlu0 %755 }
 0x1fc   : > { %v542_v58 = vpack.c.bf16 %v541_v57, %v540_v56 }
 0x1fe   : > { %2350 = vmatmul.mubr.msk.bf16.vlgmr.msra.gmra.mrb[0].mxu1 %vm452_vm1, %v542_v58 }
 0x1ff   : > { %2361 = vmatprep.mubr.msk.bf16.mxu1 %vm2900_vm0, %v4109_v0  ;;  %v3309_v7 = vpop.permute.xlu0 %1130 }
 0x203   : > { %v3313_v9 = vpop.permute.xlu0 %1156 }
 0x207   : > { %v3317_v11 = vpop.permute.xlu0 %1485 }
 0x20b   : > { %v3325_v13 = vpop.permute.xlu0 %1005 }
 0x20f   : > { %v3331_v15 = vpop.permute.xlu0 %1031 }
 0x213   : > { %v3339_v17 = vpop.permute.xlu0 %1500 }
 0x217   : > { %v3345_v19 = vpop.permute.xlu0 %1526 }
 0x21b   : > { %v3353_v21 = vpop.permute.xlu0 %1855 }
 0x21f   : > { %v3359_v23 = vpop.permute.xlu0 %1375 }
 0x223   : > { %v3370_v26 = vpop.permute.xlu0 %1401 }
 0x224   : > { %4139 = vst [vmem:[#allocation21_spill] sm:$0xff] %v3370_v26 }
 0x227   : > { %v3373_v29 = vpop.permute.xlu0 %1870 }
 0x228   : > { %4140 = vst [vmem:[#allocation22_spill] sm:$0xff] %v3373_v29 }
 0x22b   : > { %v3375_v30 = vpop.permute.xlu0 %1896 }
 0x22c   : > { %4141 = vst [vmem:[#allocation23_spill] sm:$0xff] %v3375_v30 }
 0x22f   : > { %v3377_v31 = vpop.permute.xlu0 %1743 }
 0x233   : > { %v3379_v32 = vpop.permute.xlu0 %1769 }
 0x237   : > { %v3381_v34 = vpop.permute.xlu0 %747 }
 0x238   : > { %4142 = vst [vmem:[#allocation24_spill] sm:$0xff] %v3381_v34 }
 0x23b   : > { %v3384_v38 = vpop.permute.xlu0 %773 }
 0x23c   : > { %4143 = vst [vmem:[#allocation25_spill] sm:$0xff] %v3384_v38 }
 0x2d1   : > { %v3263_v59 = vpop.f32.mrb[0].mxu1 }
 0x2d2   : > { %697 = vrot.lane.b32.xlu1 %v3263_v59, %s4111_s29  ;;  %v2351_v60 = vpop.f32.mrb[1].mxu1  ;;  %v610_v5 = vsel %vm609_vm2, %v3263_v59, 0.0 }
 0x2d3   : > { %v3267_v61 = vpop.f32.mrb[2].mxu1 }
 0x2d4   : > { %1077 = vrot.lane.b32.xlu0 %v3267_v61, %s4113_s18  ;;  %v2352_v62 = vpop.f32.mrb[3].mxu1  ;;  %v3273_v63 = vpack.c.bf16 %v3267_v61, %v3263_v59  ;;  %v613_v2 = vsel %vm609_vm2, %v3267_v61, 0.0 }
 0x2d6   : > { %4138 = vst [vmem:[#allocation20_spill] sm:$0xff] %v3273_v63  ;;  %1075 = vrot.lane.b32.xlu1 %v3263_v59, %s4113_s18 }
 0x2d8   : > { %952 = vrot.lane.b32.xlu0 %v3267_v61, %s2917_s30 }
 0x2da   : > { %950 = vrot.lane.b32.xlu1 %v3263_v59, %s2917_s30 }
 0x2dc   : > { %1447 = vrot.lane.b32.xlu0 %v3267_v61, %s2918_s21 }
 0x2de   : > { %1445 = vrot.lane.b32.xlu1 %v3263_v59, %s2918_s21 }
 0x2e0   : > { %1322 = vrot.lane.b32.xlu0 %v3267_v61, %s2919_s11 }
 0x2e2   : > { %1320 = vrot.lane.b32.xlu1 %v3263_v59, %s2919_s11 }
 0x2e4   : > { %1817 = vrot.lane.b32.xlu0 %v3267_v61, %s2920_s3 }
 0x2e6   : > { %1815 = vrot.lane.b32.xlu1 %v3263_v59, %s2920_s3 }
 0x2e8   : > { %1692 = vrot.lane.b32.xlu0 %v3267_v61, %s2921_s28 }
 0x2ea   : > { %1690 = vrot.lane.b32.xlu1 %v3263_v59, %s2921_s28 }
 0x307   : > { %614 = vadd.xlane.f32.xlu0 %v613_v2 }
 0x30e   : > { %611 = vadd.xlane.f32.xlu1 %v610_v5 }
 0x31f   : > { %699 = vrot.lane.b32.xlu1 %v3267_v61, %s4111_s29 }
 0x323   : > { %1524 = vrot.lane.b32.xlu1 %v3196_v40, %s2906_s15 }
 0x327   : > { %1360 = vrot.lane.b32.xlu1 %v3218_v41, %s2912_s20 }
 0x32b   : > { %1373 = vrot.lane.b32.xlu1 %v3196_v40, %s2911_s27 }
 0x32f   : > { %1399 = vrot.lane.b32.xlu1 %v3196_v40, %s2912_s20 }
 0x333   : > { %1868 = vrot.lane.b32.xlu1 %v3196_v40, %s4105_s19  ;;  %s4149_s19 = smov 42  }
 0x337   : > { %1894 = vrot.lane.b32.xlu1 %v3196_v40, %s4107_s22  ;;  %s4148_s22 = smov 34  }
 0x33b   : > { %1730 = vrot.lane.b32.xlu1 %v3218_v41, %s2915_s25 }
 0x33f   : > { %1745 = vrot.lane.b32.xlu1 %v3191_v39, %s2914_s24 }
 0x343   : > { %1771 = vrot.lane.b32.xlu1 %v3191_v39, %s2915_s25 }
 0x344   : > { %v698_v24 = vpop.permute.xlu1 %697 }
 0x345   : > { %v703_v37 = vsel %vm609_vm2, %v698_v24, 0.0 }
 0x346   : > { %v1078_v45 = vpop.permute.xlu0 %1077 }
 0x347   : > { %749 = vrot.lane.b32.xlu1 %v3366_v25, %s2901_s12  ;;  %s2922_s12 = smov 2  }
 0x348   : > { %v1076_v27 = vpop.permute.xlu1 %1075 }
 0x349   : > { %v1081_v28 = vsel %vm609_vm2, %v1076_v27, 0.0 }
 0x34a   : > { %1082 = vadd.xlane.f32.xlu0 %v1081_v28  ;;  %v953_v49 = vpop.permute.xlu0 %952  ;;  %v1084_v28 = vsel %vm609_vm2, %v1078_v45, 0.0 }
 0x34c   : > { %v951_v33 = vpop.permute.xlu1 %950 }
 0x34d   : > { %v956_v43 = vsel %vm609_vm2, %v951_v33, 0.0  ;;  %v959_v33 = vsel %vm609_vm2, %v953_v49, 0.0 }
 0x34e   : > { %v1448_v52 = vpop.permute.xlu0 %1447 }
 0x350   : > { %v1446_v36 = vpop.permute.xlu1 %1445 }
 0x351   : > { %v1451_v46 = vsel %vm609_vm2, %v1446_v36, 0.0  ;;  %v1454_v36 = vsel %vm609_vm2, %v1448_v52, 0.0 }
 0x352   : > { %v1323_v54 = vpop.permute.xlu0 %1322 }
 0x354   : > { %v1321_v44 = vpop.permute.xlu1 %1320 }
 0x355   : > { %v1326_v48 = vsel %vm609_vm2, %v1321_v44, 0.0 }
 0x356   : > { %v1818_v55 = vpop.permute.xlu0 %1817 }
 0x358   : > { %v1816_v47 = vpop.permute.xlu1 %1815 }
 0x359   : > { %v1821_v50 = vsel %vm609_vm2, %v1816_v47, 0.0 }
 0x35a   : > { %v1693_v56 = vpop.permute.xlu0 %1692 }
 0x35b   : > { %v1699_v47 = vsel %vm609_vm2, %v1693_v56, 0.0 }
 0x35c   : > { %v1691_v51 = vpop.permute.xlu1 %1690 }
 0x35d   : > { %v1696_v53 = vsel %vm609_vm2, %v1691_v51, 0.0 }
 0x36b   : > { %704 = vadd.xlane.f32.xlu1 %v703_v37 }
 0x36f   : > { %957 = vadd.xlane.f32.xlu1 %v956_v43  ;;  %v1329_v43 = vsel %vm609_vm2, %v1323_v54, 0.0 }
 0x373   : > { %1452 = vadd.xlane.f32.xlu1 %v1451_v46  ;;  %v1824_v46 = vsel %vm609_vm2, %v1818_v55, 0.0 }
 0x377   : > { %1327 = vadd.xlane.f32.xlu1 %v1326_v48 }
 0x37b   : > { %1822 = vadd.xlane.f32.xlu1 %v1821_v50 }
 0x37f   : > { %1697 = vadd.xlane.f32.xlu1 %v1696_v53 }
 0x394   : > { %v615_v57 = vpop.xlane.xlu0 %614 }
 0x395   : > { %v618_v58 = vmul.f32 0.125, %v615_v57 }
 0x397   : > { %v3392_v60 = vsub.f32 %v3267_v61, %v618_v58 }
 0x399   : > { %v622_v62 = vmul.f32 %v3392_v60, %v3392_v60 }
 0x39b   : > { %v612_v2 = vpop.xlane.xlu1 %611  ;;  %v626_v5 = vsel %vm609_vm2, %v622_v62, 0.0 }
 0x39c   : > { %627 = vadd.xlane.f32.xlu1 %v626_v5  ;;  %v617_v37 = vmul.f32 0.125, %v612_v2 }
 0x39e   : > { %v3403_v44 = vsub.f32 %v3263_v59, %v617_v37 }
 0x39f   : > { %v700_v24 = vpop.permute.xlu1 %699 }
 0x3a0   : > { %v706_v27 = vsel %vm609_vm2, %v700_v24, 0.0  ;;  %4144 = vst [vmem:[#allocation26_spill] sm:$0xff] %v3403_v44  ;;  %v621_v45 = vmul.f32 %v3403_v44, %v3403_v44 }
 0x3a1   : > { %707 = vadd.xlane.f32.xlu0 %v706_v27 }
 0x3a2   : > { %v623_v48 = vsel %vm609_vm2, %v621_v45, 0.0 }
 0x3a3   : > { %v3410_v49 = vpop.permute.xlu1 %1524 }
 0x3a5   : > { %1085 = vadd.xlane.f32.xlu0 %v1084_v28 }
 0x3a7   : > { %v3412_v50 = vpop.permute.xlu1 %1360 }
 0x3a9   : > { %960 = vadd.xlane.f32.xlu0 %v959_v33 }
 0x3ab   : > { %v3414_v51 = vpop.permute.xlu1 %1373 }
 0x3ad   : > { %1455 = vadd.xlane.f32.xlu0 %v1454_v36 }
 0x3af   : > { %v3416_v52 = vpop.permute.xlu1 %1399 }
 0x3b1   : > { %1330 = vadd.xlane.f32.xlu0 %v1329_v43 }
 0x3b3   : > { %v3418_v53 = vpop.permute.xlu1 %1868 }
 0x3b5   : > { %1825 = vadd.xlane.f32.xlu0 %v1824_v46 }
 0x3b7   : > { %v3420_v54 = vpop.permute.xlu1 %1894 }
 0x3b9   : > { %1700 = vadd.xlane.f32.xlu0 %v1699_v47 }
 0x3bb   : > { %v3422_v55 = vpop.permute.xlu1 %1730 }
 0x3bd   : > { %624 = vadd.xlane.f32.xlu0 %v623_v48 }
 0x3bf   : > { %v3424_v56 = vpop.permute.xlu1 %1745 }
 0x3c0   : > { %4145 = vst [vmem:[#allocation27_spill] sm:$0xff] %v3424_v56 }
 0x3c3   : > { %v3426_v57 = vpop.permute.xlu1 %1771 }
 0x3c4   : > { %4146 = vst [vmem:[#allocation28_spill] sm:$0xff] %v3426_v57 }
 0x3c7   : > { %v3428_v58 = vpop.permute.xlu1 %749 }
 0x3c8   : > { %4147 = vst [vmem:[#allocation29_spill] sm:$0xff] %v3428_v58 }
 0x3d7   : > { %v1083_v62 = vpop.xlane.xlu0 %1082 }
 0x3d8   : > { %v1087_v5 = vmul.f32 0.125, %v1083_v62 }
 0x3da   : > { %v3434_v33 = vsub.f32 %v3263_v59, %v1087_v5 }
 0x3dc   : > { %v1091_v45 = vmul.f32 %v3434_v33, %v3434_v33 }
 0x3f8   : > { %v705_v2 = vpop.xlane.xlu1 %704 }
 0x3f9   : > { %v709_v24 = vmul.f32 0.125, %v705_v2 }
 0x3fb   : > { %v3431_v27 = vsub.f32 %v3263_v59, %v709_v24 }
 0x3fc   : > { %v958_v28 = vpop.xlane.xlu1 %957 }
 0x3fd   : > { %v962_v36 = vmul.f32 0.125, %v958_v28  ;;  %v713_v37 = vmul.f32 %v3431_v27, %v3431_v27 }
 0x3ff   : > { %717 = vrot.lane.b32.xlu1 %v713_v37, %s4111_s29  ;;  %v3440_v46 = vsub.f32 %v3263_v59, %v962_v36 }
 0x400   : > { %v1453_v43 = vpop.xlane.xlu1 %1452 }
 0x401   : > { %v1457_v47 = vmul.f32 0.125, %v1453_v43  ;;  %v966_v5 = vmul.f32 %v3440_v46, %v3440_v46 }
 0x403   : > { %1095 = vrot.lane.b32.xlu1 %v1091_v45, %s4113_s18  ;;  %v3446_v62 = vsub.f32 %v3263_v59, %v1457_v47 }
 0x404   : > { %v1328_v48 = vpop.xlane.xlu1 %1327 }
 0x405   : > { %v1332_v2 = vmul.f32 0.125, %v1328_v48  ;;  %v1461_v37 = vmul.f32 %v3446_v62, %v3446_v62 }
 0x407   : > { %970 = vrot.lane.b32.xlu1 %v966_v5, %s2917_s30  ;;  %v3452_v28 = vsub.f32 %v3263_v59, %v1332_v2 }
 0x408   : > { %v1823_v24 = vpop.xlane.xlu1 %1822 }
 0x409   : > { %v1827_v36 = vmul.f32 0.125, %v1823_v24  ;;  %v1336_v48 = vmul.f32 %v3452_v28, %v3452_v28 }
 0x40b   : > { %1465 = vrot.lane.b32.xlu1 %v1461_v37, %s2918_s21  ;;  %v3458_v47 = vsub.f32 %v3263_v59, %v1827_v36 }
 0x40c   : > { %v1698_v43 = vpop.xlane.xlu1 %1697 }
 0x40d   : > { %v1702_v45 = vmul.f32 0.125, %v1698_v43  ;;  %v1831_v2 = vmul.f32 %v3458_v47, %v3458_v47 }
 0x40f   : > { %1340 = vrot.lane.b32.xlu1 %v1336_v48, %s2919_s11  ;;  %v3464_v5 = vsub.f32 %v3263_v59, %v1702_v45 }
 0x411   : > { %v1706_v24 = vmul.f32 %v3464_v5, %v3464_v5 }
 0x413   : > { %1835 = vrot.lane.b32.xlu1 %v1831_v2, %s2920_s3 }
 0x417   : > { %1710 = vrot.lane.b32.xlu1 %v1706_v24, %s2921_s28 }
 0x429   : > { %v3551_v58 = vpop.xlane.xlu1 %627 }
 0x42e   : > { %v708_v36 = vpop.xlane.xlu0 %707 }
 0x42f   : > { %v710_v37 = vmul.f32 0.125, %v708_v36 }
 0x431   : > { %v3473_v43 = vsub.f32 %v3267_v61, %v710_v37 }
 0x432   : > { %v1086_v0 = vpop.xlane.xlu0 %1085 }
 0x433   : > { %v1088_v48 = vmul.f32 0.125, %v1086_v0  ;;  %v714_v59 = vmul.f32 %v3473_v43, %v3473_v43 }
 0x435   : > { %v3478_v45 = vsub.f32 %v3267_v61, %v1088_v48  ;;  %719 = vrot.lane.b32.xlu0 %v714_v59, %s4111_s29  ;;  %s4150_s29 = smov 8  }
 0x436   : > { %v961_v0 = vpop.xlane.xlu0 %960 }
 0x437   : > { %v1092_v2 = vmul.f32 %v3478_v45, %v3478_v45  ;;  %v963_v24 = vmul.f32 0.125, %v961_v0 }
 0x439   : > { %649 = vrot.lane.b32.xlu0 %v3196_v40, %s2922_s12  ;;  %1097 = vrot.lane.b32.xlu1 %v1092_v2, %s4113_s18  ;;  %s4151_s18 = smov 10   ;;  %v3515_v37 = vsub.f32 %v3267_v61, %v963_v24 }
 0x43a   : > { %v1456_v40 = vpop.xlane.xlu0 %1455 }
 0x43b   : > { %v1458_v48 = vmul.f32 0.125, %v1456_v40  ;;  %v967_v35 = vmul.f32 %v3515_v37, %v3515_v37 }
 0x43d   : > { %1120 = vrot.lane.b32.xlu0 %v3250_v42, %s2905_s26  ;;  %775 = vrot.lane.b32.xlu1 %v3366_v25, %s4148_s22  ;;  %s4152_s22 = smov 50   ;;  %v3522_v2 = vsub.f32 %v3267_v61, %v1458_v48 }
 0x43e   : > { %v1331_v36 = vpop.xlane.xlu0 %1330 }
 0x43f   : > { %v1333_v0 = vmul.f32 0.125, %v1331_v36  ;;  %v1462_v63 = vmul.f32 %v3522_v2, %v3522_v2 }
 0x441   : > { %1146 = vrot.lane.b32.xlu0 %v3250_v42, %s4149_s19  ;;  %651 = vrot.lane.b32.xlu1 %v3191_v39, %s2922_s12  ;;  %v3530_v40 = vsub.f32 %v3267_v61, %v1333_v0 }
 0x442   : > { %v1826_v59 = vpop.xlane.xlu0 %1825 }
 0x443   : > { %v1828_v24 = vmul.f32 0.125, %v1826_v59 }
 0x445   : > { %995 = vrot.lane.b32.xlu0 %v3250_v42, %s4150_s29  ;;  %1122 = vrot.lane.b32.xlu1 %v3366_v25, %s2905_s26  ;;  %v3538_v36 = vsub.f32 %v3267_v61, %v1828_v24 }
 0x446   : > { %v1701_v38 = vpop.xlane.xlu0 %1700 }
 0x447   : > { %v1703_v48 = vmul.f32 0.125, %v1701_v38  ;;  %v1832_v59 = vmul.f32 %v3538_v36, %v3538_v36 }
 0x449   : > { %1021 = vrot.lane.b32.xlu0 %v3250_v42, %s4151_s18  ;;  %1148 = vrot.lane.b32.xlu1 %v3366_v25, %s4149_s19  ;;  %v3546_v0 = vsub.f32 %v3267_v61, %v1703_v48  ;;  %s2923_s19 = smov 126  }
 0x44b   : > { %4153 = vst [vmem:[#allocation30_spill] sm:$0xff] %v3546_v0 }
 0x44d   : > { %1490 = vrot.lane.b32.xlu0 %v3250_v42, %s2906_s15  ;;  %997 = vrot.lane.b32.xlu1 %v3366_v25, %s4150_s29 }
 0x451   : > { %1516 = vrot.lane.b32.xlu0 %v3250_v42, %s4152_s22  ;;  %1023 = vrot.lane.b32.xlu1 %v3366_v25, %s4151_s18  ;;  %s4156_s18 = smov 58  }
 0x455   : > { %1365 = vrot.lane.b32.xlu0 %v3250_v42, %s2912_s20  ;;  %1492 = vrot.lane.b32.xlu1 %v3366_v25, %s2906_s15 }
 0x459   : > { %1391 = vrot.lane.b32.xlu0 %v3250_v42, %s2911_s27  ;;  %1518 = vrot.lane.b32.xlu1 %v3366_v25, %s4152_s22 }
 0x45d   : > { %1367 = vrot.lane.b32.xlu1 %v3366_v25, %s2912_s20  ;;  %972 = vrot.lane.b32.xlu0 %v967_v35, %s2917_s30  ;;  %v1337_v35 = vmul.f32 %v3530_v40, %v3530_v40 }
 0x461   : > { %1393 = vrot.lane.b32.xlu1 %v3366_v25, %s2911_s27  ;;  %1467 = vrot.lane.b32.xlu0 %v1462_v63, %s2918_s21  ;;  %v1707_v63 = vmul.f32 %v3546_v0, %v3546_v0  ;;  %s4155_s27 = smov 56  }
 0x465   : > { %1342 = vrot.lane.b32.xlu0 %v1337_v35, %s2919_s11 }
 0x469   : > { %1837 = vrot.lane.b32.xlu0 %v1832_v59, %s2920_s3 }
 0x46d   : > { %1712 = vrot.lane.b32.xlu0 %v1707_v63, %s2921_s28 }
 0x471   : > { %v718_v38 = vpop.permute.xlu1 %717 }
 0x472   : > { %v723_v48 = vsel %vm609_vm2, %v718_v38, 0.0 }
 0x475   : > { %v1096_v24 = vpop.permute.xlu1 %1095 }
 0x476   : > { %v1101_v57 = vsel %vm609_vm2, %v1096_v24, 0.0 }
 0x479   : > { %v971_v34 = vpop.permute.xlu1 %970 }
 0x47a   : > { %v976_v61 = vsel %vm609_vm2, %v971_v34, 0.0 }
 0x47d   : > { %v1466_v44 = vpop.permute.xlu1 %1465 }
 0x47e   : > { %v1471_v0 = vsel %vm609_vm2, %v1466_v44, 0.0 }
 0x481   : > { %v1341_v35 = vpop.permute.xlu1 %1340 }
 0x482   : > { %v1346_v30 = vsel %vm609_vm2, %v1341_v35, 0.0 }
 0x485   : > { %1102 = vadd.xlane.f32.xlu1 %v1101_v57  ;;  %v1836_v56 = vpop.permute.xlu1 %1835  ;;  %v3561_v57 = vpop.xlane.xlu0 %624 }
 0x486   : > { %v1841_v24 = vsel %vm609_vm2, %v1836_v56, 0.0  ;;  %4154 = vst [vmem:[#allocation31_spill] sm:$0xff] %v3561_v57 }
 0x489   : > { %977 = vadd.xlane.f32.xlu1 %v976_v61  ;;  %v1711_v59 = vpop.permute.xlu1 %1710 }
 0x48a   : > { %v1716_v63 = vsel %vm609_vm2, %v1711_v59, 0.0 }
 0x48c   : > { %724 = vadd.xlane.f32.xlu0 %v723_v48 }
 0x48d   : > { %1472 = vadd.xlane.f32.xlu1 %v1471_v0 }
 0x490   : > { %1717 = vadd.xlane.f32.xlu0 %v1716_v63 }
 0x491   : > { %1347 = vadd.xlane.f32.xlu1 %v1346_v30 }
 0x495   : > { %1842 = vadd.xlane.f32.xlu1 %v1841_v24 }
 0x4a6   : > { %1862 = vrot.lane.b32.xlu1 %v3366_v25, %s4155_s27 }
 0x4a7   : > { %v720_v34 = vpop.permute.xlu0 %719 }
 0x4a8   : > { %v726_v38 = vsel %vm609_vm2, %v720_v34, 0.0 }
 0x4a9   : > { %727 = vadd.xlane.f32.xlu0 %v726_v38 }
 0x4aa   : > { %1888 = vrot.lane.b32.xlu1 %v3366_v25, %s4156_s18 }
 0x4ab   : > { %v1098_v44 = vpop.permute.xlu1 %1097  ;;  %v3568_v0 = vpop.permute.xlu0 %649 }
 0x4ac   : > { %4157 = vst [vmem:[#allocation32_spill] sm:$0xff] %v3568_v0  ;;  %v1104_v30 = vsel %vm609_vm2, %v1098_v44, 0.0 }
 0x4ad   : > { %1105 = vadd.xlane.f32.xlu0 %v1104_v30 }
 0x4ae   : > { %1737 = vrot.lane.b32.xlu1 %v3366_v25, %s2915_s25 }
 0x4af   : > { %v3573_v56 = vpop.permute.xlu0 %1120 }
 0x4b0   : > { %4158 = vst [vmem:[#allocation33_spill] sm:$0xff] %v3573_v56 }
 0x4b2   : > { %1763 = vrot.lane.b32.xlu1 %v3366_v25, %s2914_s24 }
 0x4b3   : > { %v3577_v35 = vpop.permute.xlu0 %1146 }
 0x4b4   : > { %4159 = vst [vmem:[#allocation34_spill] sm:$0xff] %v3577_v35 }
 0x4b7   : > { %v3579_v61 = vpop.permute.xlu0 %995 }
 0x4b8   : > { %4160 = vst [vmem:[#allocation35_spill] sm:$0xff] %v3579_v61 }
 0x4bb   : > { %v3581_v48 = vpop.permute.xlu0 %1021 }
 0x4bc   : > { %4161 = vst [vmem:[#allocation36_spill] sm:$0xff] %v3581_v48 }
 0x4bf   : > { %v3583_v59 = vpop.permute.xlu0 %1490 }
 0x4c0   : > { %4162 = vst [vmem:[#allocation37_spill] sm:$0xff] %v3583_v59 }
 0x4c3   : > { %v3585_v63 = vpop.permute.xlu0 %1516 }
 0x4c4   : > { %4163 = vst [vmem:[#allocation38_spill] sm:$0xff] %v3585_v63  ;;  %v3595_v63 = vpop.permute.xlu1 %775 }
 0x4c5   : > { %4166 = vst [vmem:[#allocation41_spill] sm:$0xff] %v3595_v63 }
 0x4c7   : > { %v3587_v24 = vpop.permute.xlu0 %1365 }
 0x4c8   : > { %4164 = vst [vmem:[#allocation39_spill] sm:$0xff] %v3587_v24  ;;  %v3597_v24 = vpop.permute.xlu1 %651 }
 0x4cb   : > { %v3589_v34 = vpop.permute.xlu0 %1391 }
 0x4cc   : > { %4165 = vst [vmem:[#allocation40_spill] sm:$0xff] %v3589_v34  ;;  %v3599_v34 = vpop.permute.xlu1 %1122 }
 0x4cd   : > { %4167 = vst [vmem:[#allocation42_spill] sm:$0xff] %v3599_v34 }
 0x4cf   : > { %v973_v38 = vpop.permute.xlu0 %972 }
 0x4d0   : > { %v979_v44 = vsel %vm609_vm2, %v973_v38, 0.0  ;;  %v3601_v38 = vpop.permute.xlu1 %1148 }
 0x4d1   : > { %980 = vadd.xlane.f32.xlu0 %v979_v44  ;;  %4168 = vst [vmem:[#allocation43_spill] sm:$0xff] %v3601_v38 }
 0x4d3   : > { %v1468_v30 = vpop.permute.xlu0 %1467 }
 0x4d4   : > { %v1474_v56 = vsel %vm609_vm2, %v1468_v30, 0.0 }
 0x4d5   : > { %1475 = vadd.xlane.f32.xlu0 %v1474_v56  ;;  %v3605_v56 = vpop.permute.xlu1 %997 }
 0x4d6   : > { %4169 = vst [vmem:[#allocation44_spill] sm:$0xff] %v3605_v56 }
 0x4d7   : > { %v1343_v35 = vpop.permute.xlu0 %1342 }
 0x4d8   : > { %v1349_v61 = vsel %vm609_vm2, %v1343_v35, 0.0 }
 0x4d9   : > { %1350 = vadd.xlane.f32.xlu0 %v1349_v61  ;;  %v3607_v44 = vpop.permute.xlu1 %1023 }
 0x4da   : > { %4170 = vst [vmem:[#allocation45_spill] sm:$0xff] %v3607_v44 }
 0x4db   : > { %v1838_v48 = vpop.permute.xlu0 %1837 }
 0x4dc   : > { %v1844_v59 = vsel %vm609_vm2, %v1838_v48, 0.0 }
 0x4dd   : > { %1845 = vadd.xlane.f32.xlu0 %v1844_v59  ;;  %v3609_v35 = vpop.permute.xlu1 %1492 }
 0x4de   : > { %4171 = vst [vmem:[#allocation46_spill] sm:$0xff] %v3609_v35 }
 0x4df   : > { %v1713_v48 = vpop.permute.xlu0 %1712 }
 0x4e0   : > { %v1719_v30 = vsel %vm609_vm2, %v1713_v48, 0.0 }
 0x4e1   : > { %v3611_v61 = vpop.permute.xlu1 %1518 }
 0x4e2   : > { %4172 = vst [vmem:[#allocation47_spill] sm:$0xff] %v3611_v61 }
 0x4e5   : > { %v3613_v59 = vpop.permute.xlu1 %1367 }
 0x4e6   : > { %4173 = vst [vmem:[#allocation48_spill] sm:$0xff] %v3613_v59 }
 0x4e9   : > { %v3616_v34 = vpop.permute.xlu1 %1393 }
 0x4ea   : > { %4174 = vst [vmem:[#allocation49_spill] sm:$0xff] %v3616_v34 }
 0x4f3   : > { %1860 = vrot.lane.b32.xlu0 %v3250_v42, %s4155_s27 }
 0x512   : > { %1720 = vadd.xlane.f32.xlu0 %v1719_v30  ;;  %v1103_v63 = vpop.xlane.xlu1 %1102 }
 0x513   : > { %v1107_v29 = vmul.f32 0.125, %v1103_v63 }
 0x515   : > { %v1109_v56 = vadd.f32 1e-06, %v1107_v29 }
 0x516   : > { %v978_v44 = vpop.xlane.xlu1 %977 }
 0x517   : > { %v982_v35 = vmul.f32 0.125, %v978_v44 }
 0x519   : > { %v725_v38 = vpop.xlane.xlu0 %724  ;;  %v984_v59 = vadd.f32 1e-06, %v982_v35 }
 0x51a   : > { %v729_v0 = vmul.f32 0.125, %v725_v38  ;;  %v1473_v30 = vpop.xlane.xlu1 %1472 }
 0x51b   : > { %v1477_v38 = vmul.f32 0.125, %v1473_v30 }
 0x51c   : > { %v731_v57 = vadd.f32 1e-06, %v729_v0 }
 0x51e   : > { %2637 = vrsqrt.f32 %v731_v57  ;;  %v1479_v57 = vadd.f32 1e-06, %v1477_v38  ;;  %v1348_v44 = vpop.xlane.xlu1 %1347 }
 0x51f   : > { %2639 = vrsqrt.f32 %v1109_v56  ;;  %v1718_v56 = vpop.xlane.xlu0 %1717 }
 0x520   : > { %2641 = vrsqrt.f32 %v984_v59 }
 0x521   : > { %2643 = vrsqrt.f32 %v1479_v57 }
 0x522   : > { %v1843_v34 = vpop.xlane.xlu1 %1842 }
 0x528   : > { %v2638_v26 = vpop.eup %2637  ;;  %1886 = vrot.lane.b32.xlu0 %v3250_v42, %s4156_s18 }
 0x529   : > { %v735_v48 = vmul.f32 %v2638_v26, %v3431_v27  ;;  %v2640_v29 = vpop.eup %2639  ;;  %v1352_v27 = vmul.f32 0.125, %v1348_v44  ;;  %v1847_v44 = vmul.f32 0.125, %v1843_v34 }
 0x52a   : > { %v1113_v63 = vmul.f32 %v2640_v29, %v3434_v33  ;;  %v2642_v30 = vpop.eup %2641 }
 0x52b   : > { %v3624_v0 = vmul.f32 %v3297_v1, %v735_v48  ;;  %v1354_v33 = vadd.f32 1e-06, %v1352_v27 }
 0x52c   : > { %1735 = vrot.lane.b32.xlu0 %v3250_v42, %s2915_s25  ;;  %v3633_v35 = vmul.f32 %v3315_v10, %v1113_v63 }
 0x52d   : > { %v761_v26 = vmul.f32 %v3303_v4, %v3624_v0  ;;  %v787_v48 = vmul.f32 %v3307_v6, %v3624_v0  ;;  %v988_v4 = vmul.f32 %v2642_v30, %v3440_v46  ;;  %v1849_v46 = vadd.f32 1e-06, %v1847_v44 }
 0x52e   : > { %v1134_v57 = vmul.f32 %v3321_v12, %v3633_v35  ;;  %v1160_v27 = vmul.f32 %v3327_v14, %v3633_v35 }
 0x530   : > { %1761 = vrot.lane.b32.xlu0 %v3250_v42, %s2914_s24  ;;  %s4175_s24 = smov 96  }
 0x534   : > { %765 = vrot.lane.b32.xlu0 %v761_v26, %s2923_s19  ;;  %v3643_v26 = vmul.f32 %v3335_v16, %v988_v4 }
 0x536   : > { %v728_v59 = vpop.xlane.xlu0 %727 }
 0x537   : > { %v730_v38 = vmul.f32 0.125, %v728_v59  ;;  %v2644_v59 = vpop.eup %2643 }
 0x538   : > { %791 = vrot.lane.b32.xlu0 %v787_v48, %s2922_s12  ;;  %v1483_v12 = vmul.f32 %v2644_v59, %v3446_v62  ;;  %v1722_v48 = vmul.f32 0.125, %v1718_v56 }
 0x539   : > { %v732_v29 = vadd.f32 1e-06, %v730_v38  ;;  %v1035_v38 = vmul.f32 %v3349_v20, %v3643_v26 }
 0x53a   : > { %v1106_v61 = vpop.xlane.xlu0 %1105  ;;  %v3653_v30 = vmul.f32 %v3317_v11, %v1483_v12  ;;  %v1724_v62 = vadd.f32 1e-06, %v1722_v48 }
 0x53b   : > { %2645 = vrsqrt.f32 %v732_v29  ;;  %v1108_v63 = vmul.f32 0.125, %v1106_v61  ;;  %v1009_v61 = vmul.f32 %v3341_v18, %v3643_v26 }
 0x53c   : > { %1138 = vrot.lane.b32.xlu0 %v1134_v57, %s2923_s19  ;;  %2647 = vrsqrt.f32 %v1354_v33  ;;  %v1504_v57 = vmul.f32 %v3355_v22, %v3653_v30 }
 0x53d   : > { %v1110_v6 = vadd.f32 1e-06, %v1108_v63 }
 0x53f   : > { %2649 = vrsqrt.f32 %v1110_v6 }
 0x540   : > { %1164 = vrot.lane.b32.xlu0 %v1160_v27, %s2922_s12  ;;  %2651 = vrsqrt.f32 %v1849_v46  ;;  %v630_v27 = vmul.f32 0.125, %v3551_v58 }
 0x541   : > { %2653 = vrsqrt.f32 %v1724_v62 }
 0x542   : > { %v632_v59 = vadd.f32 1e-06, %v630_v27 }
 0x544   : > { %1013 = vrot.lane.b32.xlu0 %v1009_v61, %s2923_s19  ;;  %2655 = vrsqrt.f32 %v632_v59 }
 0x545   : > { %v2646_v34 = vpop.eup %2645 }
 0x546   : > { %v736_v14 = vmul.f32 %v2646_v34, %v3473_v43  ;;  %v2648_v33 = vpop.eup %2647 }
 0x547   : > { %v1358_v4 = vmul.f32 %v2648_v33, %v3452_v28  ;;  %v1530_v28 = vmul.f32 %v3410_v49, %v3653_v30 }
 0x548   : > { %v3659_v29 = vmul.f32 %v3297_v1, %v736_v14  ;;  %1039 = vrot.lane.b32.xlu0 %v1035_v38, %s2922_s12 }
 0x549   : > { %v2650_v18 = vpop.eup %2649  ;;  %v3674_v1 = vmul.f32 %v3412_v50, %v1358_v4 }
 0x54a   : > { %v1114_v56 = vmul.f32 %v2650_v18, %v3478_v45  ;;  %v762_v43 = vmul.f32 %v3301_v3, %v3659_v29  ;;  %v788_v22 = vmul.f32 %v3311_v8, %v3659_v29  ;;  %v2652_v45 = vpop.eup %2651  ;;  %v2518_v62 = vpack.i.bf16 %v3659_v29, %v3624_v0 }
 0x54b   : > { %v1379_v63 = vmul.f32 %v3414_v51, %v3674_v1  ;;  %v1405_v49 = vmul.f32 %v3416_v52, %v3674_v1 }
 0x54c   : > { %v3669_v20 = vmul.f32 %v3315_v10, %v1114_v56  ;;  %1508 = vrot.lane.b32.xlu0 %v1504_v57, %s2923_s19  ;;  %767 = vrot.lane.b32.xlu1 %v762_v43, %s2923_s19  ;;  %v1853_v10 = vmul.f32 %v2652_v45, %v3458_v47  ;;  %v2654_v47 = vpop.eup %2653 }
 0x54e   : > { %v2523_v3 = vpack.i.bf16 %v3669_v20, %v3633_v35  ;;  %v1135_v44 = vmul.f32 %v3309_v7, %v3669_v20  ;;  %v3692_v8 = vmul.f32 %v3353_v21, %v1853_v10  ;;  %v1161_v6 = vmul.f32 %v3313_v9, %v3669_v20  ;;  %v2656_v38 = vpop.eup %2655 }
 0x54f   : > { %v1728_v7 = vmul.f32 %v2654_v47, %v3464_v5 }
 0x550   : > { %1534 = vrot.lane.b32.xlu0 %v1530_v28, %s2922_s12  ;;  %793 = vrot.lane.b32.xlu1 %v788_v22, %s2922_s12  ;;  %v1874_v51 = vmul.f32 %v3418_v53, %v3692_v8  ;;  %v1900_v9 = vmul.f32 %v3420_v54, %v3692_v8 }
 0x551   : > { %v3706_v52 = vmul.f32 %v3422_v55, %v1728_v7  ;;  %v4179_v7 = vld [vmem:[#allocation31_spill] sm:$0xff] }
 0x553   : > { %v1749_v5 = vmul.f32 %v3377_v31, %v3706_v52  ;;  %v1775_v14 = vmul.f32 %v3379_v32, %v3706_v52  ;;  %v636_v31 = vmul.f32 %v2656_v38, %v3392_v60  ;;  %v4181_v38 = vld [vmem:[#allocation27_spill] sm:$0xff] }
 0x554   : > { %1383 = vrot.lane.b32.xlu0 %v1379_v63, %s2923_s19  ;;  %1140 = vrot.lane.b32.xlu1 %v1135_v44, %s2923_s19 }
 0x555   : > { %v3723_v32 = vmul.f32 %v3218_v41, %v636_v31  ;;  %v4182_v31 = vld [vmem:[#allocation28_spill] sm:$0xff] }
 0x557   : > { %v656_v60 = vmul.f32 %v3597_v24, %v3723_v32 }
 0x558   : > { %1409 = vrot.lane.b32.xlu0 %v1405_v49, %s2922_s12  ;;  %1166 = vrot.lane.b32.xlu1 %v1161_v6, %s2922_s12 }
 0x55c   : > { %1878 = vrot.lane.b32.xlu0 %v1874_v51, %s2923_s19  ;;  %v629_v51 = vmul.f32 0.125, %v4179_v7 }
 0x55e   : > { %v981_v46 = vpop.xlane.xlu0 %980 }
 0x55f   : > { %v983_v58 = vmul.f32 0.125, %v981_v46 }
 0x560   : > { %1904 = vrot.lane.b32.xlu0 %v1900_v9, %s2922_s12  ;;  %v631_v9 = vadd.f32 1e-06, %v629_v51 }
 0x561   : > { %v985_v12 = vadd.f32 1e-06, %v983_v58 }
 0x562   : > { %v1476_v61 = vpop.xlane.xlu0 %1475 }
 0x563   : > { %2657 = vrsqrt.f32 %v985_v12  ;;  %v1478_v53 = vmul.f32 0.125, %v1476_v61 }
 0x564   : > { %1753 = vrot.lane.b32.xlu0 %v1749_v5, %s2923_s19  ;;  %v4180_v5 = vld [vmem:[#allocation30_spill] sm:$0xff] }
 0x565   : > { %v1480_v34 = vadd.f32 1e-06, %v1478_v53 }
 0x566   : > { %v1351_v48 = vpop.xlane.xlu0 %1350 }
 0x567   : > { %2659 = vrsqrt.f32 %v1480_v34  ;;  %v1353_v54 = vmul.f32 0.125, %v1351_v48 }
 0x568   : > { %1779 = vrot.lane.b32.xlu0 %v1775_v14, %s2922_s12 }
 0x569   : > { %v1355_v33 = vadd.f32 1e-06, %v1353_v54 }
 0x56a   : > { %v1846_v18 = vpop.xlane.xlu0 %1845 }
 0x56b   : > { %2661 = vrsqrt.f32 %v1355_v33  ;;  %v1848_v56 = vmul.f32 0.125, %v1846_v18 }
 0x56c   : > { %2519 = vrot.lane.b32.xlu0 %v2518_v62, %s4175_s24 }
 0x56d   : > { %v2658_v4 = vpop.eup %2657  ;;  %v1850_v22 = vadd.f32 1e-06, %v1848_v56  ;;  %v4183_v56 = vld [vmem:[#allocation26_spill] sm:$0xff] }
 0x56e   : > { %v989_v57 = vmul.f32 %v2658_v4, %v3515_v37 }
 0x56f   : > { %2663 = vrsqrt.f32 %v1850_v22 }
 0x570   : > { %v3726_v43 = vmul.f32 %v3335_v16, %v989_v57  ;;  %671 = vrot.lane.b32.xlu0 %v3366_v25, %s2922_s12  ;;  %v678_v16 = vmul.f32 %v3723_v32, %v3191_v39 }
 0x571   : > { %v2660_v28 = vpop.eup %2659 }
 0x572   : > { %v1484_v45 = vmul.f32 %v2660_v28, %v3522_v2  ;;  %v1010_v10 = vmul.f32 %v3325_v13, %v3726_v43  ;;  %v1036_v25 = vmul.f32 %v3331_v15, %v3726_v43  ;;  %v2533_v51 = vpack.i.bf16 %v3726_v43, %v3643_v26 }
 0x574   : > { %661 = vrot.lane.b32.xlu0 %v656_v60, %s2923_s19  ;;  %1015 = vrot.lane.b32.xlu1 %v1010_v10, %s2923_s19  ;;  %v3738_v41 = vmul.f32 %v3317_v11, %v1484_v45  ;;  %v4184_v60 = vld [vmem:[#allocation24_spill] sm:$0xff]  ;;  %v4185_v10 = vld [vmem:[#allocation29_spill] sm:$0xff] }
 0x575   : > { %v2662_v37 = vpop.eup %2661  ;;  %v753_v45 = vmul.f32 %v4184_v60, %v3624_v0 }
 0x576   : > { %v1359_v13 = vmul.f32 %v2662_v37, %v3530_v40  ;;  %v1505_v2 = vmul.f32 %v3339_v17, %v3738_v41  ;;  %v1531_v39 = vmul.f32 %v3345_v19, %v3738_v41  ;;  %v4176_v40 = vld [vmem:[#allocation21_spill] sm:$0xff]  ;;  %v4177_v19 = vld [vmem:[#allocation22_spill] sm:$0xff]  ;;  %v4186_v37 = vld [vmem:[#allocation32_spill] sm:$0xff] }
 0x578   : > { %683 = vrot.lane.b32.xlu0 %v678_v16, %s2922_s12  ;;  %1041 = vrot.lane.b32.xlu1 %v1036_v25, %s2922_s12  ;;  %v3751_v11 = vmul.f32 %v3412_v50, %v1359_v13  ;;  %v754_v16 = vmul.f32 %v4185_v10, %v3659_v29 }
 0x579   : > { %v2664_v24 = vpop.eup %2663 }
 0x57a   : > { %v1854_v15 = vmul.f32 %v2664_v24, %v3538_v36  ;;  %v1380_v63 = vmul.f32 %v3359_v23, %v3751_v11  ;;  %v1406_v50 = vmul.f32 %v4176_v40, %v3751_v11  ;;  %v4178_v36 = vld [vmem:[#allocation23_spill] sm:$0xff]  ;;  %v3772_v23 = vpop.permute.xlu0 %1860  ;;  %v4187_v24 = vld [vmem:[#allocation25_spill] sm:$0xff] }
 0x57b   : > { %v4188_v40 = vld [vmem:[#allocation41_spill] sm:$0xff] }
 0x57c   : > { %1510 = vrot.lane.b32.xlu1 %v1505_v2, %s2923_s19  ;;  %v3761_v17 = vmul.f32 %v3353_v21, %v1854_v15  ;;  %v3774_v21 = vpop.permute.xlu1 %1862  ;;  %v779_v15 = vmul.f32 %v4187_v24, %v3624_v0  ;;  %v4189_v0 = vld [vmem:[#allocation33_spill] sm:$0xff] }
 0x57e   : > { %v1875_v44 = vmul.f32 %v4177_v19, %v3761_v17  ;;  %v1901_v49 = vmul.f32 %v4178_v36, %v3761_v17 }
 0x580   : > { %1536 = vrot.lane.b32.xlu1 %v1531_v39, %s2922_s12  ;;  %v3779_v46 = vpop.permute.xlu1 %1888 }
 0x584   : > { %1385 = vrot.lane.b32.xlu1 %v1380_v63, %s2923_s19  ;;  %v3783_v12 = vpop.permute.xlu1 %1737 }
 0x588   : > { %1411 = vrot.lane.b32.xlu1 %v1406_v50, %s2922_s12  ;;  %v1764_v48 = vpop.permute.xlu1 %1763  ;;  %v780_v50 = vmul.f32 %v4188_v40, %v3659_v29  ;;  %v4190_v29 = vld [vmem:[#allocation42_spill] sm:$0xff] }
 0x589   : > { %v1127_v7 = vmul.f32 %v4190_v29, %v3669_v20 }
 0x58c   : > { %1880 = vrot.lane.b32.xlu1 %v1875_v44, %s2923_s19 }
 0x590   : > { %1906 = vrot.lane.b32.xlu1 %v1901_v49, %s2922_s12  ;;  %v2702_v49 = vld [vmem:[%s4086_s8] sm:$0xff] }
 0x59f   : > { %v1721_v6 = vpop.xlane.xlu0 %1720 }
 0x5a0   : > { %v1723_v47 = vmul.f32 0.125, %v1721_v6 }
 0x5a2   : > { %v1725_v27 = vadd.f32 1e-06, %v1723_v47  ;;  %v1126_v47 = vmul.f32 %v4189_v0, %v3633_v35 }
 0x5a3   : > { %v3777_v59 = vpop.permute.xlu0 %1886 }
 0x5a4   : > { %2665 = vrsqrt.f32 %v1725_v27 }
 0x5a5   : > { %2667 = vrsqrt.f32 %v631_v9 }
 0x5a7   : > { %v3781_v58 = vpop.permute.xlu0 %1735 }
 0x5ab   : > { %v3786_v34 = vpop.permute.xlu0 %1761 }
 0x5ae   : > { %v2666_v61 = vpop.eup %2665 }
 0x5af   : > { %v1729_v53 = vmul.f32 %v2666_v61, %v4180_v5  ;;  %v2668_v18 = vpop.eup %2667  ;;  %v766_v62 = vpop.permute.xlu0 %765 }
 0x5b0   : > { %v635_v57 = vmul.f32 %v2668_v18, %v4183_v56  ;;  %v771_v2 = vsub.f32 %v753_v45, %v766_v62  ;;  %v4193_v18 = vld [vmem:[#allocation43_spill] sm:$0xff]  ;;  %v4195_v45 = vld [vmem:[#allocation44_spill] sm:$0xff] }
 0x5b1   : > { %v3789_v14 = vmul.f32 %v3422_v55, %v1729_v53  ;;  %v2701_v55 = vld [vmem:[#allocation7] ss:$0 sm:$0xff]  ;;  %v1153_v62 = vmul.f32 %v4193_v18, %v3669_v20  ;;  %v4194_v20 = vld [vmem:[#allocation35_spill] sm:$0xff]  ;;  %v1002_v10 = vmul.f32 %v4195_v45, %v3726_v43 }
 0x5b2   : > { %v3801_v22 = vmul.f32 %v2701_v55, %v635_v57  ;;  %v1001_v60 = vmul.f32 %v4194_v20, %v3643_v26 }
 0x5b3   : > { %v3792_v54 = vmul.f32 %v1764_v48, %v3789_v14  ;;  %v1750_v33 = vmul.f32 %v4181_v38, %v3789_v14  ;;  %v1776_v4 = vmul.f32 %v4182_v31, %v3789_v14  ;;  %v792_v28 = vpop.permute.xlu0 %791  ;;  %v4191_v48 = vld [vmem:[#allocation34_spill] sm:$0xff] }
 0x5b4   : > { %v655_v13 = vmul.f32 %v4186_v37, %v3801_v22  ;;  %v797_v44 = vadd.f32 %v792_v28, %v779_v15  ;;  %v677_v6 = vmul.f32 %v2702_v49, %v3801_v22  ;;  %v1152_v38 = vmul.f32 %v4191_v48, %v3633_v35  ;;  %v4197_v15 = vld [vmem:[#allocation45_spill] sm:$0xff]  ;;  %v4199_v49 = vld [vmem:[#allocation46_spill] sm:$0xff] }
 0x5b5   : > { %1755 = vrot.lane.b32.xlu1 %v1750_v33, %s2923_s19  ;;  %v2543_v28 = vpack.i.bf16 %v3738_v41, %v3653_v30 }
 0x5b7   : > { %v1139_v19 = vpop.permute.xlu0 %1138 }
 0x5b8   : > { %v1144_v61 = vsub.f32 %v1126_v47, %v1139_v19 }
 0x5b9   : > { %1781 = vrot.lane.b32.xlu1 %v1776_v4, %s2922_s12 }
 0x5bb   : > { %v1165_v53 = vpop.permute.xlu0 %1164 }
 0x5bc   : > { %v1170_v4 = vadd.f32 %v1165_v53, %v1152_v38  ;;  %v4202_v38 = vld [vmem:[#allocation39_spill] sm:$0xff] }
 0x5bd   : > { %669 = vrot.lane.b32.xlu1 %v3250_v42, %s2922_s12 }
 0x5be   : > { %v768_v25 = vpop.permute.xlu1 %767 }
 0x5bf   : > { %v772_v39 = vsub.f32 %v754_v16, %v768_v25  ;;  %v1014_v35 = vpop.permute.xlu0 %1013 }
 0x5c0   : > { %v1019_v25 = vsub.f32 %v1001_v60, %v1014_v35  ;;  %v4205_v35 = vld [vmem:[#allocation49_spill] sm:$0xff] }
 0x5c1   : > { %v2528_v63 = vpack.i.bf16 %v772_v39, %v771_v2  ;;  %659 = vrot.lane.b32.xlu1 %v655_v13, %s2923_s19  ;;  %s4192_s19 = smov 88   ;;  %v4196_v2 = vld [vmem:[#allocation36_spill] sm:$0xff] }
 0x5c2   : > { %v794_v42 = vpop.permute.xlu1 %793  ;;  %v1027_v39 = vmul.f32 %v4196_v2, %v3643_v26 }
 0x5c3   : > { %v798_v36 = vadd.f32 %v794_v42, %v780_v50  ;;  %2529 = vrot.lane.b32.xlu0 %v2528_v63, %s4175_s24  ;;  %v1028_v63 = vmul.f32 %v4197_v15, %v3726_v43  ;;  %v4198_v42 = vld [vmem:[#allocation37_spill] sm:$0xff]  ;;  %v4200_v43 = vld [vmem:[#allocation38_spill] sm:$0xff]  ;;  %v1892_v15 = vmul.f32 %v3777_v59, %v3692_v8 }
 0x5c4   : > { %v1522_v29 = vmul.f32 %v4200_v43, %v3653_v30 }
 0x5c5   : > { %v2538_v27 = vpack.i.bf16 %v798_v36, %v797_v44  ;;  %681 = vrot.lane.b32.xlu1 %v677_v6, %s2922_s12  ;;  %v1496_v44 = vmul.f32 %v4198_v42, %v3653_v30  ;;  %v1497_v6 = vmul.f32 %v4199_v49, %v3738_v41  ;;  %v1742_v49 = vmul.f32 %v3783_v12, %v3789_v14 }
 0x5c6   : > { %v1141_v9 = vpop.permute.xlu1 %1140 }
 0x5c7   : > { %v1145_v5 = vsub.f32 %v1127_v7, %v1141_v9  ;;  %2534 = vrot.lane.b32.xlu0 %v2533_v51, %s2917_s30  ;;  %v4201_v51 = vld [vmem:[#allocation47_spill] sm:$0xff] }
 0x5c8   : > { %v1523_v9 = vmul.f32 %v4201_v51, %v3738_v41  ;;  %v4204_v41 = vld [vmem:[#allocation40_spill] sm:$0xff] }
 0x5c9   : > { %v2548_v33 = vpack.i.bf16 %v1145_v5, %v1144_v61  ;;  %2524 = vrot.lane.b32.xlu1 %v2523_v3, %s4192_s19  ;;  %v1040_v3 = vpop.permute.xlu0 %1039 }
 0x5ca   : > { %v1167_v31 = vpop.permute.xlu1 %1166  ;;  %v1045_v50 = vadd.f32 %v1040_v3, %v1027_v39  ;;  %v1398_v3 = vmul.f32 %v4205_v35, %v3751_v11 }
 0x5cb   : > { %v1171_v56 = vadd.f32 %v1167_v31, %v1153_v62  ;;  %v4203_v62 = vld [vmem:[#allocation48_spill] sm:$0xff] }
 0x5cc   : > { %v1372_v31 = vmul.f32 %v4203_v62, %v3751_v11 }
 0x5cd   : > { %v2553_v57 = vpack.i.bf16 %v1171_v56, %v1170_v4  ;;  %2539 = vrot.lane.b32.xlu1 %v2538_v27, %s4175_s24  ;;  %v1509_v55 = vpop.permute.xlu0 %1508 }
 0x5ce   : > { %v1514_v27 = vsub.f32 %v1496_v44, %v1509_v55 }
 0x5cf   : > { %2554 = vrot.lane.b32.xlu0 %v2553_v57, %s4192_s19  ;;  %v1397_v57 = vmul.f32 %v4204_v41, %v3674_v1 }
 0x5d1   : > { %2544 = vrot.lane.b32.xlu1 %v2543_v28, %s2918_s21  ;;  %v1535_v13 = vpop.permute.xlu0 %1534 }
 0x5d2   : > { %v1540_v5 = vadd.f32 %v1535_v13, %v1522_v29 }
 0x5d5   : > { %2549 = vrot.lane.b32.xlu1 %v2548_v33, %s4192_s19  ;;  %v1384_v0 = vpop.permute.xlu0 %1383  ;;  %v1371_v33 = vmul.f32 %v4202_v38, %v3674_v1  ;;  %s2311_s19 = sshll.u32 %s3003_s17, 8 }
 0x5d7   : > { %v1389_v56 = vsub.f32 %v1371_v33, %v1384_v0  ;;  %v1767_v0 = vmul.f32 %v3786_v34, %v3706_v52 }
 0x5d9   : > { %v1410_v48 = vpop.permute.xlu0 %1409 }
 0x5da   : > { %v1415_v60 = vadd.f32 %v1410_v48, %v1397_v57  ;;  %v2704_v57 = vld [vmem:[%s4085_s7 + $0x8] sm:$0xff] }
 0x5dd   : > { %v1879_v55 = vpop.permute.xlu0 %1878 }
 0x5e1   : > { %v1905_v39 = vpop.permute.xlu0 %1904 }
 0x5e5   : > { %v1754_v59 = vpop.permute.xlu0 %1753 }
 0x5e6   : > { %v1016_v16 = vpop.permute.xlu1 %1015 }
 0x5e7   : > { %v1020_v37 = vsub.f32 %v1002_v10, %v1016_v16  ;;  %v1866_v10 = vmul.f32 %v3772_v23, %v3692_v8  ;;  %v1867_v16 = vmul.f32 %v3774_v21, %v3761_v17 }
 0x5e9   : > { %v2558_v24 = vpack.i.bf16 %v1020_v37, %v1019_v25  ;;  %v1884_v13 = vsub.f32 %v1866_v10, %v1879_v55  ;;  %v1780_v42 = vpop.permute.xlu0 %1779 }
 0x5ea   : > { %v1042_v40 = vpop.permute.xlu1 %1041 }
 0x5eb   : > { %v1046_v19 = vadd.f32 %v1042_v40, %v1028_v63  ;;  %2559 = vrot.lane.b32.xlu0 %v2558_v24, %s2917_s30  ;;  %v1893_v24 = vmul.f32 %v3779_v46, %v3761_v17  ;;  %v2603_v46 = vpack.i.bf16 %v3761_v17, %v3692_v8  ;;  %v1785_v17 = vadd.f32 %v1780_v42, %v1767_v0 }
 0x5ed   : > { %v2563_v36 = vpack.i.bf16 %v1046_v19, %v1045_v50  ;;  %v1910_v50 = vadd.f32 %v1905_v39, %v1892_v15  ;;  %v2593_v19 = vpack.i.bf16 %v3751_v11, %v3674_v1  ;;  %v2520_v44 = vpop.permute.xlu0 %2519 }
 0x5ee   : > { %v1511_v47 = vpop.permute.xlu1 %1510  ;;  %v2521_v62 = vunpack.i.l.bf16 %v2520_v44 }
 0x5ef   : > { %v1515_v26 = vsub.f32 %v1497_v6, %v1511_v47  ;;  %2564 = vrot.lane.b32.xlu1 %v2563_v36, %s2917_s30  ;;  %v1741_v36 = vmul.f32 %v3781_v58, %v3706_v52  ;;  %v2618_v58 = vpack.i.bf16 %v3789_v14, %v3706_v52  ;;  %s2924_s30 = smov 64  }
 0x5f1   : > { %v2568_v7 = vpack.i.bf16 %v1515_v26, %v1514_v27  ;;  %v1759_v1 = vsub.f32 %v1741_v36, %v1754_v59  ;;  %v672_v27 = vpop.permute.xlu0 %671 }
 0x5f2   : > { %v1537_v61 = vpop.permute.xlu1 %1536 }
 0x5f3   : > { %v1541_v53 = vadd.f32 %v1537_v61, %v1523_v9  ;;  %2569 = vrot.lane.b32.xlu0 %v2568_v7, %s2918_s21 }
 0x5f5   : > { %v2573_v18 = vpack.i.bf16 %v1541_v53, %v1540_v5  ;;  %v662_v12 = vpop.permute.xlu0 %661 }
 0x5f6   : > { %v1386_v4 = vpop.permute.xlu1 %1385 }
 0x5f7   : > { %v1390_v30 = vsub.f32 %v1372_v31, %v1386_v4  ;;  %2574 = vrot.lane.b32.xlu1 %v2573_v18, %s2918_s21  ;;  %v2522_v18 = vunpack.i.h.bf16 %v2520_v44  ;;  %v676_v31 = vmul.f32 %v672_v27, %v3723_v32  ;;  %s4033_s21 = scalar_lea.hbm %s4088_s10, %s2311_s19 }
 0x5f9   : > { %v2578_v28 = vpack.i.bf16 %v1390_v30, %v1389_v56  ;;  %v684_v34 = vpop.permute.xlu0 %683 }
 0x5fa   : > { %v1412_v20 = vpop.permute.xlu1 %1411  ;;  %v688_v35 = vadd.f32 %v684_v34, %v676_v31 }
 0x5fb   : > { %v1416_v45 = vadd.f32 %v1412_v20, %v1398_v3  ;;  %2579 = vrot.lane.b32.xlu0 %v2578_v28, %s2919_s11  ;;  %v646_v28 = vmul.f32 %v2704_v57, %v3723_v32 }
 0x5fd   : > { %v2583_v25 = vpack.i.bf16 %v1416_v45, %v1415_v60  ;;  %v666_v10 = vsub.f32 %v646_v28, %v662_v12 }
 0x5fe   : > { %v1881_v37 = vpop.permute.xlu1 %1880 }
 0x5ff   : > { %v1885_v2 = vsub.f32 %v1867_v16, %v1881_v37  ;;  %2584 = vrot.lane.b32.xlu1 %v2583_v25, %s2919_s11 }
 0x601   : > { %v2588_v63 = vpack.i.bf16 %v1885_v2, %v1884_v13  ;;  %v691_v13 = vsel %vm689_vm3, %v666_v10, %v688_v35 }
 0x602   : > { %v1907_v40 = vpop.permute.xlu1 %1906  ;;  %v694_v59 = vsel %vm692_vm4, %v691_v13, %v3723_v32 }
 0x603   : > { %v1911_v23 = vadd.f32 %v1907_v40, %v1893_v24  ;;  %2589 = vrot.lane.b32.xlu0 %v2588_v63, %s2920_s3  ;;  %v4206_v40 = vmov 0.0  }
 0x605   : > { %v2598_v21 = vpack.i.bf16 %v1911_v23, %v1910_v50 }
 0x607   : > { %2594 = vrot.lane.b32.xlu0 %v2593_v19, %s2919_s11  ;;  %2599 = vrot.lane.b32.xlu1 %v2598_v21, %s2920_s3  ;;  %s2925_s11 = smov [#allocation10]  }
 0x60b   : > { %2604 = vrot.lane.b32.xlu1 %v2603_v46, %s2920_s3 }
 0x627   : > { %v1756_v6 = vpop.permute.xlu1 %1755 }
 0x628   : > { %v1760_v11 = vsub.f32 %v1742_v49, %v1756_v6 }
 0x62a   : > { %v2608_v47 = vpack.i.bf16 %v1760_v11, %v1759_v1 }
 0x62b   : > { %v1782_v8 = vpop.permute.xlu1 %1781 }
 0x62c   : > { %v1786_v26 = vadd.f32 %v1782_v8, %v3792_v54  ;;  %2609 = vrot.lane.b32.xlu0 %v2608_v47, %s2921_s28  ;;  %v2703_v54 = vld [vmem:[%s4085_s7] sm:$0xff] }
 0x62d   : > { %v645_v53 = vmul.f32 %v2703_v54, %v3801_v22 }
 0x62e   : > { %v2613_v43 = vpack.i.bf16 %v1786_v26, %v1785_v17 }
 0x62f   : > { %v670_v29 = vpop.permute.xlu1 %669 }
 0x630   : > { %2619 = vrot.lane.b32.xlu0 %v2618_v58, %s2921_s28  ;;  %2614 = vrot.lane.b32.xlu1 %v2613_v43, %s2921_s28  ;;  %v675_v5 = vmul.f32 %v670_v29, %v3801_v22 }
 0x633   : > { %v660_v7 = vpop.permute.xlu1 %659 }
 0x634   : > { %v665_v60 = vsub.f32 %v645_v53, %v660_v7 }
 0x635   : > { %v2530_v9 = vpop.permute.xlu0 %2529 }
 0x636   : > { %v2532_v14 = vunpack.i.h.bf16 %v2530_v9  ;;  %v2531_v48 = vunpack.i.l.bf16 %v2530_v9 }
 0x637   : > { %v682_v51 = vpop.permute.xlu1 %681 }
 0x638   : > { %v687_v56 = vadd.f32 %v682_v51, %v675_v5 }
 0x639   : > { %v2535_v4 = vpop.permute.xlu0 %2534 }
 0x63a   : > { %v690_v25 = vsel %vm689_vm3, %v665_v60, %v687_v56  ;;  %v2537_v27 = vunpack.i.h.bf16 %v2535_v4  ;;  %v2536_v8 = vunpack.i.l.bf16 %v2535_v4 }
 0x63b   : > { %v2525_v61 = vpop.permute.xlu1 %2524  ;;  %v693_v50 = vsel %vm692_vm4, %v690_v25, %v3801_v22 }
 0x63c   : > { %v2527_v23 = vunpack.i.h.bf16 %v2525_v61  ;;  %v2526_v21 = vunpack.i.l.bf16 %v2525_v61  ;;  %v827_v36 = vpack.c.bf16 %v694_v59, %v693_v50 }
 0x63f   : > { %v2540_v52 = vpop.permute.xlu1 %2539 }
 0x640   : > { %v2542_v38 = vunpack.i.h.bf16 %v2540_v52  ;;  %v2541_v33 = vunpack.i.l.bf16 %v2540_v52 }
 0x641   : > { %v2555_v16 = vpop.permute.xlu0 %2554 }
 0x642   : > { %v823_v30 = vsel %vm689_vm3, %v2531_v48, %v2541_v33  ;;  %v824_v41 = vsel %vm689_vm3, %v2532_v14, %v2542_v38  ;;  %v2557_v39 = vunpack.i.h.bf16 %v2555_v16  ;;  %v2556_v24 = vunpack.i.l.bf16 %v2555_v16 }
 0x643   : > { %v2545_v3 = vpop.permute.xlu1 %2544  ;;  %v825_v55 = vsel %vm692_vm4, %v823_v30, %v2521_v62  ;;  %v826_v20 = vsel %vm692_vm4, %v824_v41, %v2522_v18 }
 0x644   : > { %v828_v45 = vpack.c.bf16 %v826_v20, %v825_v55  ;;  %v2547_v5 = vunpack.i.h.bf16 %v2545_v3  ;;  %v2546_v54 = vunpack.i.l.bf16 %v2545_v3 }
 0x646   : > { %v833_v37 = vsel %vm609_vm2, %v828_v45, 0 }
 0x647   : > { %v2550_v2 = vpop.permute.xlu1 %2549  ;;  %2354 = vmatpush3.bf16.xpose.msra.mxu0 %v833_v37 }
 0x648   : > { %v2552_v15 = vunpack.i.h.bf16 %v2550_v2  ;;  %v2551_v63 = vunpack.i.l.bf16 %v2550_v2  ;;  %2365 = vmatprep.subr.bf16.mxu0 %v4206_v40 }
 0x64a   : > { %v1196_v19 = vsel %vm689_vm3, %v2551_v63, %v2556_v24  ;;  %v1197_v46 = vsel %vm689_vm3, %v2552_v15, %v2557_v39 }
 0x64b   : > { %v1198_v42 = vsel %vm692_vm4, %v1196_v19, %v2526_v21  ;;  %v1199_v44 = vsel %vm692_vm4, %v1197_v46, %v2527_v23 }
 0x64c   : > { %v1201_v49 = vpack.c.bf16 %v1199_v44, %v1198_v42 }
 0x64e   : > { %2356 = vmatmul.mubr.msk.bf16.vlgmr.msra.gmra.mrb[4].mxu0 %vm609_vm2, %v827_v36  ;;  %v1206_v6 = vsel %vm609_vm2, %v1201_v49, 0 }
 0x64f   : > { %2366 = vmatpush3.bf16.xpose.msra.mxu0 %v1206_v6  ;;  %2367 = vmatprep.mubr.msk.bf16.mxu0 %vm2900_vm0, %v4206_v40 }
 0x650   : > { %2377 = vmatprep.subr.bf16.mxu0 %v4206_v40 }
 0x65d   : > { %v2560_v22 = vpop.permute.xlu0 %2559 }
 0x65e   : > { %v2562_v11 = vunpack.i.h.bf16 %v2560_v22  ;;  %v2561_v32 = vunpack.i.l.bf16 %v2560_v22 }
 0x661   : > { %v2565_v1 = vpop.permute.xlu1 %2564 }
 0x662   : > { %v2567_v0 = vunpack.i.h.bf16 %v2565_v1  ;;  %v2566_v47 = vunpack.i.l.bf16 %v2565_v1 }
 0x664   : > { %v1071_v17 = vsel %vm689_vm3, %v2561_v32, %v2566_v47  ;;  %v1072_v26 = vsel %vm689_vm3, %v2562_v11, %v2567_v0 }
 0x665   : > { %v1073_v43 = vsel %vm692_vm4, %v1071_v17, %v2536_v8  ;;  %v1074_v58 = vsel %vm692_vm4, %v1072_v26, %v2537_v27  ;;  %v2570_v12 = vpop.permute.xlu0 %2569 }
 0x666   : > { %v1200_v29 = vpack.c.bf16 %v1074_v58, %v1073_v43  ;;  %v2572_v34 = vunpack.i.h.bf16 %v2570_v12  ;;  %v2571_v51 = vunpack.i.l.bf16 %v2570_v12 }
 0x668   : > { %2368 = vmatmul.mubr.msk.bf16.vlgmr.msra.gmra.mrb[8].mxu0 %vm609_vm2, %v1200_v29 }
 0x669   : > { %v2575_v7 = vpop.permute.xlu1 %2574  ;;  %2379 = vmatprep.mubr.msk.bf16.mxu0 %vm2900_vm0, %v4206_v40 }
 0x66a   : > { %v2577_v9 = vunpack.i.h.bf16 %v2575_v7  ;;  %v2576_v61 = vunpack.i.l.bf16 %v2575_v7 }
 0x66c   : > { %v1566_v53 = vsel %vm689_vm3, %v2571_v51, %v2576_v61  ;;  %v1567_v52 = vsel %vm689_vm3, %v2572_v34, %v2577_v9 }
 0x66d   : > { %v1568_v14 = vsel %vm692_vm4, %v1566_v53, %v2546_v54  ;;  %v1569_v48 = vsel %vm692_vm4, %v1567_v52, %v2547_v5  ;;  %v2580_v18 = vpop.permute.xlu0 %2579 }
 0x66e   : > { %v1571_v38 = vpack.c.bf16 %v1569_v48, %v1568_v14  ;;  %v2582_v30 = vunpack.i.h.bf16 %v2580_v18  ;;  %v2581_v41 = vunpack.i.l.bf16 %v2580_v18 }
 0x670   : > { %v1576_v33 = vsel %vm609_vm2, %v1571_v38, 0 }
 0x671   : > { %2378 = vmatpush3.bf16.xpose.msra.mxu0 %v1576_v33  ;;  %v2585_v62 = vpop.permute.xlu1 %2584 }
 0x672   : > { %2389 = vmatprep.subr.bf16.mxu0 %v4206_v40  ;;  %v2587_v4 = vunpack.i.h.bf16 %v2585_v62  ;;  %v2586_v56 = vunpack.i.l.bf16 %v2585_v62 }
 0x674   : > { %v1441_v55 = vsel %vm689_vm3, %v2581_v41, %v2586_v56  ;;  %v1442_v20 = vsel %vm689_vm3, %v2582_v30, %v2587_v4  ;;  %v4207_v56 = vld [vmem:[#allocation20_spill] sm:$0xff] }
 0x675   : > { %v2590_v31 = vpop.permute.xlu0 %2589 }
 0x676   : > { %v2592_v25 = vunpack.i.h.bf16 %v2590_v31  ;;  %v2591_v37 = vunpack.i.l.bf16 %v2590_v31 }
 0x679   : > { %v2600_v57 = vpop.permute.xlu1 %2599  ;;  %v2595_v28 = vpop.permute.xlu0 %2594 }
 0x67a   : > { %v2597_v35 = vunpack.i.h.bf16 %v2595_v28  ;;  %v2596_v3 = vunpack.i.l.bf16 %v2595_v28  ;;  %v2602_v60 = vunpack.i.h.bf16 %v2600_v57  ;;  %v2601_v45 = vunpack.i.l.bf16 %v2600_v57 }
 0x67c   : > { %v1443_v10 = vsel %vm692_vm4, %v1441_v55, %v2596_v3  ;;  %v1444_v16 = vsel %vm692_vm4, %v1442_v20, %v2597_v35  ;;  %v1936_v15 = vsel %vm689_vm3, %v2591_v37, %v2601_v45  ;;  %v1937_v63 = vsel %vm689_vm3, %v2592_v25, %v2602_v60 }
 0x67d   : > { %v1570_v13 = vpack.c.bf16 %v1444_v16, %v1443_v10  ;;  %v2605_v2 = vpop.permute.xlu1 %2604 }
 0x67e   : > { %v2607_v39 = vunpack.i.h.bf16 %v2605_v2  ;;  %v2606_v24 = vunpack.i.l.bf16 %v2605_v2 }
 0x67f   : > { %2380 = vmatmul.mubr.msk.bf16.vlgmr.msra.gmra.mrb[12].mxu0 %vm609_vm2, %v1570_v13 }
 0x680   : > { %v1938_v50 = vsel %vm692_vm4, %v1936_v15, %v2606_v24  ;;  %v1939_v23 = vsel %vm692_vm4, %v1937_v63, %v2607_v39  ;;  %2391 = vmatprep.mubr.msk.bf16.mxu0 %vm2900_vm0, %v4206_v40 }
 0x681   : > { %v1941_v21 = vpack.c.bf16 %v1939_v23, %v1938_v50 }
 0x683   : > { %v1946_v19 = vsel %vm609_vm2, %v1941_v21, 0 }
 0x684   : > { %2390 = vmatpush3.bf16.xpose.msra.mxu0 %v1946_v19 }
 0x685   : > { %2401 = vmatprep.subr.bf16.mxu0 %v4206_v40 }
 0x69e   : > { %v2610_v46 = vpop.permute.xlu0 %2609 }
 0x69f   : > { %v2612_v59 = vunpack.i.h.bf16 %v2610_v46  ;;  %v2611_v42 = vunpack.i.l.bf16 %v2610_v46 }
 0x6a2   : > { %v2615_v44 = vpop.permute.xlu1 %2614  ;;  %v2620_v36 = vpop.permute.xlu0 %2619 }
 0x6a3   : > { %v2617_v49 = vunpack.i.h.bf16 %v2615_v44  ;;  %v2616_v6 = vunpack.i.l.bf16 %v2615_v44  ;;  %v2622_v22 = vunpack.i.h.bf16 %v2620_v36  ;;  %v2621_v1 = vunpack.i.l.bf16 %v2620_v36 }
 0x6a5   : > { %v1811_v11 = vsel %vm689_vm3, %v2611_v42, %v2616_v6  ;;  %v1812_v32 = vsel %vm689_vm3, %v2612_v59, %v2617_v49 }
 0x6a6   : > { %v1813_v0 = vsel %vm692_vm4, %v1811_v11, %v2621_v1  ;;  %v1814_v47 = vsel %vm692_vm4, %v1812_v32, %v2622_v22 }
 0x6a7   : > { %v1940_v27 = vpack.c.bf16 %v1814_v47, %v1813_v0 }
 0x6a9   : > { %2392 = vmatmul.mubr.msk.bf16.vlgmr.msra.gmra.mrb[16].mxu0 %vm609_vm2, %v1940_v27 }
 0x6aa   : > { %2405 = vmatprep.mubr.msk.bf16.mxu0 %vm2900_vm0, %v4206_v40 }
 0x721   : > { %v869_v8 = vpop.f32.mrb[4].mxu0 }
 0x722   : > { %v2357_v17 = vpop.f32.mrb[5].mxu0  ;;  %v877_v26 = vsel %vm876_vm5, %v869_v8, -inf }
 0x723   : > { %878 = vmax.xlane.f32.xlu1 %v877_v26  ;;  %v872_v43 = vpop.f32.mrb[6].mxu0 }
 0x724   : > { %v2358_v58 = vpop.f32.mrb[7].mxu0  ;;  %v880_v29 = vsel %vm876_vm5, %v872_v43, -inf }
 0x725   : > { %881 = vmax.xlane.f32.xlu0 %v880_v29 }
 0x73b   : > { %v1242_v12 = vpop.f32.mrb[8].mxu0 }
 0x73c   : > { %v2369_v7 = vpop.f32.mrb[9].mxu0  ;;  %v1249_v34 = vsel %vm876_vm5, %v1242_v12, -inf }
 0x73d   : > { %1250 = vmax.xlane.f32.xlu0 %v1249_v34  ;;  %v1245_v51 = vpop.f32.mrb[10].mxu0 }
 0x73e   : > { %v2370_v9 = vpop.f32.mrb[11].mxu0  ;;  %v1252_v61 = vsel %vm876_vm5, %v1245_v51, -inf }
 0x741   : > { %1253 = vmax.xlane.f32.xlu0 %v1252_v61 }
 0x752   : > { %v1612_v5 = vpop.f32.mrb[12].mxu0 }
 0x753   : > { %v2381_v54 = vpop.f32.mrb[13].mxu0  ;;  %v1619_v53 = vsel %vm876_vm5, %v1612_v5, -inf }
 0x754   : > { %1620 = vmax.xlane.f32.xlu1 %v1619_v53  ;;  %v1615_v52 = vpop.f32.mrb[14].mxu0 }
 0x755   : > { %v2382_v14 = vpop.f32.mrb[15].mxu0  ;;  %v1622_v48 = vsel %vm876_vm5, %v1615_v52, -inf }
 0x756   : > { %1623 = vmax.xlane.f32.xlu0 %v1622_v48 }
 0x77c   : > { %v1982_v38 = vpop.f32.mrb[16].mxu0 }
 0x77d   : > { %v2393_v33 = vpop.f32.mrb[17].mxu0  ;;  %v1989_v18 = vsel %vm876_vm5, %v1982_v38, -inf }
 0x77e   : > { %1990 = vmax.xlane.f32.xlu1 %v1989_v18  ;;  %v1985_v62 = vpop.f32.mrb[18].mxu0 }
 0x77f   : > { %v2394_v31 = vpop.f32.mrb[19].mxu0  ;;  %v1992_v4 = vsel %vm876_vm5, %v1985_v62, -inf }
 0x780   : > { %1993 = vmax.xlane.f32.xlu0 %v1992_v4 }
 0x78f   : > { %902 = vrot.lane.b32.xlu1 %v4207_v56, %s2924_s30 }
 0x7b0   : > { %v879_v30 = vpop.xlane.xlu1 %878 }
 0x7b1   : > { %v883_v41 = vsub.f32 %v869_v8, %v879_v30 }
 0x7b2   : > { %v882_v57 = vpop.xlane.xlu0 %881 }
 0x7b3   : > { %v885_v28 = vmul.f32 1.442695, %v883_v41  ;;  %v884_v35 = vsub.f32 %v872_v43, %v882_v57 }
 0x7b5   : > { %2669 = vpow2.f32 %v885_v28  ;;  %v887_v3 = vmul.f32 1.442695, %v884_v35 }
 0x7b7   : > { %2671 = vpow2.f32 %v887_v3 }
 0x7bf   : > { %v2670_v55 = vpop.eup %2669 }
 0x7c0   : > { %v889_v20 = vsel %vm876_vm5, %v2670_v55, 0.0 }
 0x7c1   : > { %v2672_v60 = vpop.eup %2671  ;;  %890 = vadd.xlane.f32.xlu1 %v889_v20 }
 0x7c2   : > { %v892_v45 = vsel %vm876_vm5, %v2672_v60, 0.0 }
 0x7c3   : > { %893 = vadd.xlane.f32.xlu0 %v892_v45 }
 0x7ca   : > { %v1251_v10 = vpop.xlane.xlu0 %1250 }
 0x7cb   : > { %v1255_v16 = vsub.f32 %v1242_v12, %v1251_v10 }
 0x7cd   : > { %v1257_v25 = vmul.f32 1.442695, %v1255_v16 }
 0x7ce   : > { %v1254_v37 = vpop.xlane.xlu0 %1253 }
 0x7cf   : > { %2673 = vpow2.f32 %v1257_v25  ;;  %v1256_v13 = vsub.f32 %v1245_v51, %v1254_v37 }
 0x7d1   : > { %v1259_v2 = vmul.f32 1.442695, %v1256_v13 }
 0x7d3   : > { %2675 = vpow2.f32 %v1259_v2  ;;  %v2627_v2 = vld [vmem:[%s4087_s9] sm:$0xff]  }
 0x7d4   : > { %2402 = vmatpush3.bf16.msra.mxu0 %v2627_v2 }
 0x7d5   : > { %2403 = vmatprep.subr.bf16.mxu0 %v4206_v40 }
 0x7d9   : > { %v3977_v39 = vpop.eup %2673 }
 0x7da   : > { %v1261_v24 = vsel %vm876_vm5, %v3977_v39, 0.0 }
 0x7db   : > { %1262 = vadd.xlane.f32.xlu1 %v1261_v24 }
 0x7dd   : > { %v2676_v15 = vpop.eup %2675 }
 0x7de   : > { %v1264_v63 = vsel %vm876_vm5, %v2676_v15, 0.0 }
 0x7df   : > { %1265 = vadd.xlane.f32.xlu0 %v1264_v63 }
 0x7e1   : > { %v1621_v50 = vpop.xlane.xlu1 %1620 }
 0x7e2   : > { %v1625_v23 = vsub.f32 %v1612_v5, %v1621_v50  ;;  %v2628_v50 = vld [vmem:[%s4087_s9 + $0x8] sm:$0xff]  }
 0x7e3   : > { %v1624_v21 = vpop.xlane.xlu0 %1623  ;;  %2404 = vmatpush3.bf16.msra.mxu0 %v2628_v50 }
 0x7e4   : > { %v1627_v19 = vmul.f32 1.442695, %v1625_v23  ;;  %v1626_v46 = vsub.f32 %v1615_v52, %v1624_v21 }
 0x7e6   : > { %2677 = vpow2.f32 %v1627_v19  ;;  %v1629_v59 = vmul.f32 1.442695, %v1626_v46 }
 0x7e8   : > { %2679 = vpow2.f32 %v1629_v59 }
 0x7f0   : > { %v3982_v42 = vpop.eup %2677 }
 0x7f1   : > { %v1631_v44 = vsel %vm876_vm5, %v3982_v42, 0.0 }
 0x7f2   : > { %v2680_v36 = vpop.eup %2679  ;;  %1632 = vadd.xlane.f32.xlu1 %v1631_v44  ;;  %v4208_v44 = vld [vmem:[#allocation19_spill] sm:$0xff] }
 0x7f3   : > { %v1634_v49 = vsel %vm876_vm5, %v2680_v36, 0.0 }
 0x7f4   : > { %1635 = vadd.xlane.f32.xlu0 %v1634_v49 }
 0x80b   : > { %v1991_v6 = vpop.xlane.xlu1 %1990 }
 0x80c   : > { %v1995_v22 = vsub.f32 %v1982_v38, %v1991_v6 }
 0x80d   : > { %v1994_v1 = vpop.xlane.xlu0 %1993 }
 0x80e   : > { %v1997_v11 = vmul.f32 1.442695, %v1995_v22  ;;  %v1996_v32 = vsub.f32 %v1985_v62, %v1994_v1 }
 0x80f   : > { %v903_v0 = vpop.permute.xlu1 %902 }
 0x810   : > { %2681 = vpow2.f32 %v1997_v11  ;;  %v1999_v47 = vmul.f32 1.442695, %v1996_v32  ;;  %2360 = vmatpush3.bf16.msra.mxu1 %v903_v0 }
 0x811   : > { %2371 = vmatprep.subr.bf16.mxu1 %v4206_v40 }
 0x812   : > { %2683 = vpow2.f32 %v1999_v47 }
 0x81a   : > { %v2682_v27 = vpop.eup %2681 }
 0x81b   : > { %v2001_v8 = vsel %vm876_vm5, %v2682_v27, 0.0 }
 0x81c   : > { %v2684_v17 = vpop.eup %2683  ;;  %2002 = vadd.xlane.f32.xlu1 %v2001_v8 }
 0x81d   : > { %v2004_v26 = vsel %vm876_vm5, %v2684_v17, 0.0 }
 0x81e   : > { %2005 = vadd.xlane.f32.xlu0 %v2004_v26 }
 0x82d   : > { %1642 = vrot.lane.b32.xlu1 %v4207_v56, %s2906_s15 }
 0x831   : > { %2012 = vrot.lane.b32.xlu1 %v4207_v56, %s2905_s26 }
 0x834   : > { %1272 = vrot.lane.b32.xlu0 %v4207_v56, %s4155_s27 }
 0x84e   : > { %v891_v43 = vpop.xlane.xlu1 %890 }
 0x84f   : > { %2685 = vrcp.f32 %v891_v43 }
 0x850   : > { %v894_v58 = vpop.xlane.xlu0 %893 }
 0x851   : > { %2687 = vrcp.f32 %v894_v58 }
 0x859   : > { %v2686_v29 = vpop.eup %2685 }
 0x85a   : > { %v897_v7 = vmul.f32 %v2686_v29, %v2670_v55 }
 0x85b   : > { %v2688_v12 = vpop.eup %2687 }
 0x85c   : > { %v898_v34 = vmul.f32 %v2688_v12, %v2672_v60 }
 0x85e   : > { %v899_v51 = vpack.c.bf16 %v898_v34, %v897_v7 }
 0x860   : > { %2362 = vmatmul.mubr.msk.bf16.vlgmr.msra.gmra.mrb[4].mxu1 %vm876_vm5, %v899_v51 }
 0x861   : > { %2373 = vmatprep.mubr.msk.bf16.mxu1 %vm2900_vm0, %v4206_v40 }
 0x868   : > { %v1263_v61 = vpop.xlane.xlu1 %1262 }
 0x86c   : > { %v1266_v9 = vpop.xlane.xlu0 %1265 }
 0x86d   : > { %2689 = vrcp.f32 %v1266_v9 }
 0x86e   : > { %2691 = vrcp.f32 %v1263_v61 }
 0x877   : > { %v2690_v53 = vpop.eup %2689 }
 0x878   : > { %v2692_v14 = vpop.eup %2691  ;;  %v1270_v48 = vmul.f32 %v2690_v53, %v2676_v15 }
 0x879   : > { %v1269_v33 = vmul.f32 %v2692_v14, %v3977_v39 }
 0x87b   : > { %v1271_v62 = vpack.c.bf16 %v1270_v48, %v1269_v33 }
 0x87f   : > { %v1633_v54 = vpop.xlane.xlu1 %1632 }
 0x881   : > { %v1636_v5 = vpop.xlane.xlu0 %1635 }
 0x882   : > { %2693 = vrcp.f32 %v1636_v5 }
 0x883   : > { %2695 = vrcp.f32 %v1633_v54 }
 0x88c   : > { %v2694_v31 = vpop.eup %2693 }
 0x88d   : > { %v2696_v56 = vpop.eup %2695  ;;  %v1640_v30 = vmul.f32 %v2694_v31, %v2680_v36 }
 0x88e   : > { %v1639_v41 = vmul.f32 %v2696_v56, %v3982_v42 }
 0x890   : > { %v1641_v57 = vpack.c.bf16 %v1640_v30, %v1639_v41 }
 0x8a9   : > { %v2003_v38 = vpop.xlane.xlu1 %2002 }
 0x8ab   : > { %v2006_v52 = vpop.xlane.xlu0 %2005 }
 0x8ac   : > { %2697 = vrcp.f32 %v2006_v52 }
 0x8ad   : > { %2699 = vrcp.f32 %v2003_v38  ;;  %v1643_v4 = vpop.permute.xlu1 %1642 }
 0x8af   : > { %v1273_v18 = vpop.permute.xlu0 %1272 }
 0x8b0   : > { %2372 = vmatpush3.bf16.msra.mxu1 %v1273_v18 }
 0x8b1   : > { %2383 = vmatprep.subr.bf16.mxu1 %v4206_v40  ;;  %v2013_v35 = vpop.permute.xlu1 %2012 }
 0x8b3   : > { %2374 = vmatmul.mubr.msk.bf16.vlgmr.msra.gmra.mrb[8].mxu1 %vm876_vm5, %v1271_v62 }
 0x8b4   : > { %2384 = vmatpush3.bf16.msra.mxu1 %v1643_v4  ;;  %2385 = vmatprep.mubr.msk.bf16.mxu1 %vm2900_vm0, %v4206_v40 }
 0x8b5   : > { %2395 = vmatprep.subr.bf16.mxu1 %v4206_v40 }
 0x8b6   : > { %v2698_v28 = vpop.eup %2697 }
 0x8b7   : > { %v2700_v3 = vpop.eup %2699  ;;  %v2010_v55 = vmul.f32 %v2698_v28, %v2684_v17 }
 0x8b8   : > { %v2009_v20 = vmul.f32 %v2700_v3, %v2682_v27 }
 0x8ba   : > { %v2011_v60 = vpack.c.bf16 %v2010_v55, %v2009_v20 }
 0x8bb   : > { %2386 = vmatmul.mubr.msk.bf16.vlgmr.msra.gmra.mrb[12].mxu1 %vm876_vm5, %v1641_v57 }
 0x8bc   : > { %2396 = vmatpush3.bf16.msra.mxu1 %v2013_v35  ;;  %2397 = vmatprep.mubr.msk.bf16.mxu1 %vm2900_vm0, %v4206_v40 }
 0x8c3   : > { %2398 = vmatmul.mubr.msk.bf16.vlgmr.msra.gmra.mrb[16].mxu1 %vm876_vm5, %v2011_v60 }
 0x933   : > { %v942_v45 = vpop.f32.mrb[4].mxu1 }
 0x934   : > { %v2363_v10 = vpop.f32.mrb[5].mxu1 }
 0x935   : > { %v945_v16 = vpop.f32.mrb[6].mxu1 }
 0x936   : > { %v949_v25 = vpack.c.bf16 %v945_v16, %v942_v45  ;;  %v2364_v37 = vpop.f32.mrb[7].mxu1 }
 0x986   : > { %v1312_v13 = vpop.f32.mrb[8].mxu1 }
 0x987   : > { %v2375_v39 = vpop.f32.mrb[9].mxu1 }
 0x988   : > { %v1315_v24 = vpop.f32.mrb[10].mxu1 }
 0x989   : > { %v1319_v15 = vpack.c.bf16 %v1315_v24, %v1312_v13  ;;  %v2376_v63 = vpop.f32.mrb[11].mxu1 }
 0x98b   : > { %2061 = vrot.lane.b32.xlu1 %v1319_v15, %s4150_s29 }
 0x98e   : > { %v1682_v23 = vpop.f32.mrb[12].mxu1 }
 0x98f   : > { %v2387_v21 = vpop.f32.mrb[13].mxu1 }
 0x990   : > { %v1685_v19 = vpop.f32.mrb[14].mxu1 }
 0x991   : > { %v1689_v46 = vpack.c.bf16 %v1685_v19, %v1682_v23  ;;  %v2388_v59 = vpop.f32.mrb[15].mxu1 }
 0x993   : > { %2064 = vrot.lane.b32.xlu0 %v1689_v46, %s2912_s20  ;;  %s414_s20 = sand.u32 1, %s2883_s14  }
 0x994   : > { %s2282_s24 = sshll.u32 %s414_s20, 4  ;;  %s4036_s17 = scalar_lea.sflag [#allocation4], %s414_s20 }
 0x995   : > { %s416_s22 = scalar_lea.vmem [#allocation10], %s2282_s24 }
 0x996   : > { %v2052_v42 = vpop.f32.mrb[16].mxu1  ;;  %s2158_s18 = sshll.u32 %s416_s22, 4  ;;  %s4027_s18 = int_to_ptr.vmem [resolvable:$true] %s2158_s18 }
 0x997   : > { %2137 = vrot.lane.b32.xlu0 %v4208_v44, %s2924_s30  ;;  %v2399_v40 = vpop.f32.mrb[17].mxu1  ;;  %s2817_s28 = scalar_lea.vmem %s4027_s18, 256  ;;  %s2821_s30 = sshll.u32 %s2925_s11, 4  ;;  %s2822_s30 = int_to_ptr.vmem [resolvable:$false] %s2821_s30 }
 0x998   : > { %v2055_v36 = vpop.f32.mrb[18].mxu1  ;;  %p2818_p2 = scmp.ne.s32.totalorder %s4027_s18, %s2817_s28  ;;  %s2823_s26 = scalar_lea.vmem %s2822_s30, 512 }
 0x999   : > { %v2059_v49 = vpack.c.bf16 %v2055_v36, %v2052_v42  ;;  %v2400_v6 = vpop.f32.mrb[19].mxu1  ;;  %p2824_p8 = scmp.lt.s32.totalorder %s4027_s18, %s2822_s30  ;;  %p2825_p11 = scmp.lt.s32.totalorder %s2823_s26, %s2817_s28 }
 0x99a   : > { %p2819_p4 = pnand %p2818_p2, %p4209_p3 }
 0x99b   : > { %2067 = vrot.lane.b32.xlu1 %v2059_v49, %s2915_s25  ;;  %p2826_p13 = por %p2825_p11, %p2824_p8 }
 0x99c   : > { %p2820_p7 = pneg %p2819_p4 }
 0x99e   : > { %p2827_p1 = pnand %p2826_p13, %p2820_p7 }
 0x9fd   : > { %v2062_v22 = vpop.permute.xlu1 %2061 }
 0x9fe   : > { %v2071_v11 = vsel %vm609_vm2, %v949_v25, %v2062_v22 }
 0xa05   : > { %v2065_v1 = vpop.permute.xlu0 %2064 }
 0xa06   : > { %v2073_v32 = vsel %vm876_vm5, %v2071_v11, %v2065_v1 }
 0xa09   : > { %v2138_v27 = vpop.permute.xlu0 %2137 }
 0xa0d   : > { %v2068_v0 = vpop.permute.xlu1 %2067 }
 0xa0e   : > { %v2076_v47 = vsel %vm2074_vm6, %v2073_v32, %v2068_v0 }
 0xa0f   : > { %2406 = vmatmul.mubr.msk.bf16.vlgmr.msra.gmra.mrb[20].mxu0 %vm452_vm1, %v2076_v47 }
 0xae2   : > { %v2129_v8 = vpop.f32.mrb[20].mxu0 }
 0xae3   : > { %v2140_v17 = vmul.f32 %v2138_v27, %v2129_v8  ;;  %v2407_v26 = vpop.f32.mrb[21].mxu0 }
 0xae4   : > { %v2132_v43 = vpop.f32.mrb[22].mxu0 }
 0xae5   : > { %2142 = vst.msk [vmem:[%s416_s22] sm:$0xff] %vm452_vm1, %v2140_v17  ;;  %v2141_v58 = vmul.f32 %v2138_v27, %v2132_v43  ;;  %v2408_v29 = vpop.f32.mrb[23].mxu0 }
 0xae7   : > { %2143 = vst.msk [vmem:[%s416_s22 + $0x8] sm:$0xff] %vm452_vm1, %v2141_v58 }
 0xae8   : > { %2830 = shalt.err (!%p2827_p1)
}
 0xae9   : > { %s2831_s15 = scalar_lea.hbm %s4033_s21, 256  ;;  %s2835_s20 = scalar_lea.hbm %s4088_s10, 512 }
 0xaea   : > { %p2832_p0 = scmp.ne.s32.totalorder %s4033_s21, %s2831_s15  ;;  %p2836_p9 = scmp.lt.u32.totalorder %s4033_s21, %s4088_s10 }
 0xaeb   : > { %p2837_p12 = scmp.lt.u32.totalorder %s2835_s20, %s2831_s15  ;;  %p2839_p2 = scmp.lt.u32.totalorder %s2831_s15, %s4033_s21 }
 0xaec   : > { %p2833_p6 = pnand %p2832_p0, %p4209_p3 }
 0xaed   : > { %p2838_p10 = por %p2837_p12, %p2836_p9 }
 0xaee   : > { %p2834_p5 = pneg %p2833_p6 }
 0xaef   : > { %p2840_p4 = por %p2839_p2, %p2838_p10 }
 0xaf1   : > { %p2841_p7 = pnand %p2840_p4, %p2834_p5 }
 0xaf3   : > { %2844 = shalt.err (!%p2841_p7)
}
 0xaf4   : > { %s2926_s19 = smov 128  }
 0xaf5   : > { %2425 = dma.vmem_to_hbm [thread:$0]  (%p4209_p3), %s4027_s18, 256, %s4033_s21, %s4036_s17, %s2926_s19, %s2926_s19, %s4150_s29  }
 0xaf6 PF: > { %s4210_s25 = sld [smem:[#allocation18_spill]]  ;;  %p2452_p8 = scmp.ge.s32.totalorder %s2891_s16, 2 }
 0xaf7   : > { %s2173_s3 = sand.u32 1, %s2879_s13  }
 0xaf8   : > { %s2174_s28 = scalar_lea.sflag [#allocation4], %s2173_s3 }
 0xafc   : > { %p4211_p11 = scmp.ne.s32.totalorder %s4210_s25, 0 }
 0xafe   : > { %p2441_p13 = pnand %p2452_p8, %p4211_p11 }
 0xb00   : > { %2874 = dma.done.wait (!%p2441_p13), %s2174_s28, 256  }
 0xb01   : > { %2876 = vsyncadd (!%p2441_p13), %s2174_s28, 4294967040  ;;  %s4212_s16 = sld [smem:[#allocation16_spill]]  ;;  %s4213_s11 = sld [smem:[#allocation15_spill]] }
 0xb02   : > { %s4214_s15 = sld [smem:[#allocation17_spill]]  ;;  %s4215_s13 = smov %s2883_s14 }
 0xb07   : > { %p23_p1 = scmp.ge.s32.totalorder %s4212_s16, 4   ;;  %s4216_s14 = smov %s4213_s11 }
 0xb09   :  { %25 = sbr.rel (!%p23_p1) target bundleno = 8 (0x8), region = 115 }
 0xb10   :  { %2179 = vsyncpa [#allocation3], 1 }
 0xb11   :  { %2181 = vsyncpa [#allocation3 + $0x1], 1 }
 0xb12   :  { %2182 = vsyncpa [#allocation6], 1 }
 0xb13   :  { %2183 = vsyncpa [#allocation9], 1 }
 0xb14   :  { %2184 = vsyncpa [#allocation4], 1 }
 0xb15   :  { %2186 = vsyncpa [#allocation4 + $0x1], 1 }

</bundles_post_ra>
